<compile_context>
chip_gen: v7x
topology: tpu7x:2x2x1
jax: 0.10.0
libtpu: 0.0.40
codegen_flags: <defaults>
</compile_context>

<pallas_src>
import jax
import jax.numpy as jnp
from jax import lax
from jax.experimental import pallas as pl
from jax.experimental.pallas import tpu as pltpu
import numpy as np


# ----------------------------------------------------------------------------
# Small helpers
# ----------------------------------------------------------------------------
def _round_up(x, m):
    return (x + m - 1) // m * m


def _device_kind():
    try:
        return jax.devices()[0].device_kind.lower()
    except Exception:
        return ""


def _select_mxu_dtype(kind=None):
    """bf16 MXU operands on v6e/v7x (f32 accumulation); f32 elsewhere (v5e keeps
    full-precision dots).  Elementwise SiLU/sigmoid stays f32 on every chip."""
    kind = _device_kind() if kind is None else kind
    if ("v6" in kind) or ("v7" in kind) or ("7x" in kind):
        return jnp.bfloat16
    return jnp.float32


def _dual_tensorcore(kind=None):
    kind = _device_kind() if kind is None else kind
    return ("v7" in kind) or ("7x" in kind)


def _pick_batch_tiling(n, lengths, dual_core):
    """The grid is a serial loop on single-TC chips (v5e/v6e) -> one big slab.
    Split the batch into two 'parallel' tiles only on dual-TC chips (v7x)."""
    if dual_core and n >= 2 and n % 2 == 0:
        bt = n // 2
        if all((bt * l) % 8 == 0 for l in lengths):      # (8,128) block rule
            return 2, bt
    # TODO(synk): on v7x with odd/unit N, split along L into two halo'd length
    # tiles (overlapping index_map) instead of leaving a TensorCore idle.
    return 1, n


# ----------------------------------------------------------------------------
# In-kernel helpers
# ----------------------------------------------------------------------------
def _boundary_masks(rows, seg_len):
    """(rows,1) masks marking the first / last row of each length-seg_len batch
    segment of the flattened (nseg*seg_len, C) slab (unrolled, no int div)."""
    nseg = rows // seg_len
    row = lax.broadcasted_iota(jnp.int32, (rows, 1), 0)
    first = row == 0
    last = row == (seg_len - 1)
    for s in range(1, nseg):
        first = jnp.logical_or(first, row == s * seg_len)
        last = jnp.logical_or(last, row == (s * seg_len + seg_len - 1))
    return first, last


def _taps(x, rows, first_mask, last_mask):
    """Shift-by-±1 copies along rows, zeroed at segment edges (XLU roll)."""
    prev = jnp.where(first_mask, 0.0, pltpu.roll(x, shift=1, axis=0))
    nxt = jnp.where(last_mask, 0.0, pltpu.roll(x, shift=rows - 1, axis=0))
    return prev, nxt


def _conv(w_ref, row_off, cin, cols, prev, cur, nxt, mxu_dt, packed_taps):
    """Conv1d(k=3, pad=1), optionally fused over two output stacks (cols wide).

    Slab layout at row_off (see _pack_weights):
        rows [0,cin) tap t-1 | [cin,2cin) tap t | [2cin,3cin) tap t+1 | row 3cin bias
    """
    rows = cur.shape[0]
    if packed_taps:
        # One MXU push per conv: lane-packed LHS (prev|cur|next|1); the ones
        # column folds the bias into the matmul accumulator.
        ones = jnp.ones((rows, 1), jnp.float32)
        lhs = jnp.concatenate([prev, cur, nxt, ones], axis=1).astype(mxu_dt)
        w = w_ref[row_off:row_off + 3 * cin + 1, 0:cols]
        return jnp.dot(lhs, w, preferred_element_type=jnp.float32)
    # Fallback: three small dots off the same slab (used only if the unaligned
    # lane concatenation above fails to lower on this build).
    acc = jnp.dot(prev.astype(mxu_dt), w_ref[row_off:row_off + cin, 0:cols],
                  preferred_element_type=jnp.float32)
    acc = acc + jnp.dot(cur.astype(mxu_dt),
                        w_ref[row_off + cin:row_off + 2 * cin, 0:cols],
                        preferred_element_type=jnp.float32)
    acc = acc + jnp.dot(nxt.astype(mxu_dt),
                        w_ref[row_off + 2 * cin:row_off + 3 * cin, 0:cols],
                        preferred_element_type=jnp.float32)
    bias = w_ref[row_off + 3 * cin:row_off + 3 * cin + 1, 0:cols].astype(jnp.float32)
    return acc + bias


def _make_encoder_kernel(batch_tile, l0, blocks, mxu_dt, packed_taps):
    n_blocks = len(blocks)

    def kernel(x_ref, w_ref, *out_refs):
        x = x_ref[...]                       # (batch_tile*L0, C0), stays resident
        seg = l0
        for blk, m in enumerate(blocks):
            cin, cout = m["cin"], m["cout"]
            rows = batch_tile * seg
            first, last = _boundary_masks(rows, seg)

            # conv1 and conv3 consume the same taps -> fused into ONE dot with a
            # (3*cin+1, 2*cout) weight; split with a free static lane slice.
            xp, xn = _taps(x, rows, first, last)
            acc13 = _conv(w_ref, m["off13"], cin, 2 * cout, xp, x, xn,
                          mxu_dt, packed_taps)
            h1 = acc13[:, 0:cout]
            h1 = h1 * jax.nn.sigmoid(h1)              # SiLU, f32 on every chip
            res = acc13[:, cout:2 * cout]             # conv3(x) + b3 (residual)

            hp, hn = _taps(h1, rows, first, last)
            h2 = _conv(w_ref, m["off2"], cout, cout, hp, h1, hn,
                       mxu_dt, packed_taps)
            h2 = h2 * jax.nn.sigmoid(h2)              # SiLU

            y = h2 + res
            out_refs[blk][...] = y.astype(out_refs[blk].dtype)

            if blk + 1 < n_blocks:
                # Fused MaxPool1d(2): stride-2 sublane reads of the feature just
                # written (pairs never straddle a batch segment since L is even).
                half = rows // 2
                even = out_refs[blk][pl.ds(0, half, 2), :]
                odd = out_refs[blk][pl.ds(1, half, 2), :]
                x = jnp.maximum(even, odd)
                seg //= 2

    return kernel


# ----------------------------------------------------------------------------
# Weight packing: one slab for every conv weight + bias of the whole encoder
# ----------------------------------------------------------------------------
def _pack_weights(block_params, chs, mxu_dt):
    """Per block b (cin->cout), two matrices at 8-aligned row offsets:
         W13: (3*cin+1, 2*cout)  conv1|conv3 stacked along cout, taps along cin,
                                 bias row [b1|b3] appended last.
         W2 : (3*cout+1, cout)   conv2 taps + bias row.
       One slab => one DMA descriptor / one padded VMEM tile for all weights."""
    width = max(2 * c for c in chs[1:])
    entries, meta, off = [], [], 0

    def tap_stack(w):   # torch (cout, cin, 3) -> (3*cin, cout), tap-major rows
        w = np.asarray(w, np.float32)
        return np.concatenate([w[:, :, k].T for k in range(3)], axis=0)

    for b, p in enumerate(block_params):
        cin, cout = chs[b], chs[b + 1]
        w13 = np.concatenate([tap_stack(p["w1"]), tap_stack(p["w3"])], axis=1)
        b13 = np.concatenate([np.asarray(p["b1"], np.float32),
                              np.asarray(p["b3"], np.float32)])[None, :]
        w13 = np.concatenate([w13, b13], axis=0)                     # (3cin+1, 2cout)
        w2 = np.concatenate([tap_stack(p["w2"]),
                             np.asarray(p["b2"], np.float32)[None, :]], axis=0)
        off13, off = off, off + _round_up(w13.shape[0], 8)
        off2, off = off, off + _round_up(w2.shape[0], 8)
        entries += [(off13, w13), (off2, w2)]
        meta.append(dict(cin=cin, cout=cout, off13=off13, off2=off2))

    slab = np.zeros((_round_up(off, 8), width), np.float32)
    for o, m in entries:
        slab[o:o + m.shape[0], :m.shape[1]] = m
    return jnp.asarray(slab, dtype=mxu_dt), meta


# ----------------------------------------------------------------------------
# Wrapper (PyTorch NCL interface)
# ----------------------------------------------------------------------------
def encoder_forward(x_ncl, block_params, mxu_dtype=None):
    """x_ncl: (N, C0, L) float32.  Returns per-block features in NCL, like PyTorch."""
    N, C0, L0 = x_ncl.shape
    n_blocks = len(block_params)
    chs = [C0] + [int(p["w1"].shape[0]) for p in block_params]
    lengths = [L0 // (2 ** i) for i in range(n_blocks)]

    kind = _device_kind()
    mxu_dt = _select_mxu_dtype(kind) if mxu_dtype is None else mxu_dtype

    # PyTorch MaxPool1d(2) floors odd lengths; the fused kernel assumes even L
    # at every pooled level (true for this model).
    l = L0
    for _ in range(n_blocks - 1):
        assert l % 2 == 0, "fused encoder requires an even length at every level"
        l //= 2

    n_tiles, batch_tile = _pick_batch_tiling(N, lengths, _dual_tensorcore(kind))

    # NCL -> flattened channels-last rows (N*L, C); tiny one-time XLA reshape.
    x_flat = jnp.transpose(x_ncl, (0, 2, 1)).reshape(N * L0, C0).astype(jnp.float32)
    w_slab, meta = _pack_weights(block_params, chs, mxu_dt)

    in_specs = [pl.BlockSpec((batch_tile * L0, C0), lambda i: (i, 0)),
                pl.BlockSpec(w_slab.shape, lambda i: (0, 0))]

    out_shapes, out_specs = [], []
    for b in range(n_blocks):
        Lb, Cb = lengths[b], chs[b + 1]
        # TODO(synk): at production channel counts pad Cb to a multiple of 128 so
        # feature stores are lane-dense full-width vst (biggest store lever); at
        # Cb=8/16 the in-kernel (rows,C)->(rows*C/128,128) relayout would cost
        # more than the masked stores it removes, so keep the natural layout.
        out_shapes.append(jax.ShapeDtypeStruct((N * Lb, Cb), jnp.float32))
        out_specs.append(pl.BlockSpec((batch_tile * Lb, Cb), lambda i: (i, 0)))

    # Advisory cost estimate + explicit VMEM limit with headroom (v7x has only
    # 64 MiB physical / 32 MiB scoped default per TensorCore).
    flops = transcendentals = 0
    bytes_accessed = x_flat.size * 4 + int(w_slab.size) * w_slab.dtype.itemsize
    for b in range(n_blocks):
        rows, cin, cout = N * lengths[b], chs[b], chs[b + 1]
        flops += 2 * rows * ((3 * cin + 1) * 2 * cout + (3 * cout + 1) * cout)
        transcendentals += 2 * rows * cout
        bytes_accessed += rows * cout * 4
    vmem_limit = int(min(32 << 20, max(16 << 20, 8 * bytes_accessed)))

    def run(packed_taps):
        kernel = _make_encoder_kernel(batch_tile, L0, meta, mxu_dt, packed_taps)
        outs = pl.pallas_call(
            kernel,
            out_shape=out_shapes,
            grid=(n_tiles,),
            in_specs=in_specs,
            out_specs=out_specs,
            compiler_params=pltpu.CompilerParams(
                dimension_semantics=("parallel",),
                vmem_limit_bytes=vmem_limit),
            cost_estimate=pl.CostEstimate(flops=int(flops),
                                          transcendentals=int(transcendentals),
                                          bytes_accessed=int(bytes_accessed)),
        )(x_flat, w_slab)
        return [jax.block_until_ready(o) for o in outs]

    try:
        ftrs_flat = run(packed_taps=True)
    except Exception:
        # Unaligned lane-concat LHS packing not supported by this lowering;
        # fall back to per-tap dots (same fused conv1/conv3 weights, same slab).
        ftrs_flat = run(packed_taps=False)

    # Back to PyTorch NCL layout (tiny one-time XLA reshapes/transposes).
    ftrs = []
    for b, f in enumerate(ftrs_flat):
        Lb, Cb = lengths[b], chs[b + 1]
        ftrs.append(jnp.transpose(f.reshape(N, Lb, Cb), (0, 2, 1)))
    return ftrs


# ----------------------------------------------------------------------------
# Deterministic parameters (PyTorch Conv1d layout: W (Cout, Cin, 3), b (Cout,))
# ----------------------------------------------------------------------------
def init_params(key, chs):
    params = []
    for i in range(len(chs) - 1):
        cin, cout = chs[i], chs[i + 1]
        keys = jax.random.split(jax.random.fold_in(key, i), 6)

        def u(k, shape, fan_in):
            s = 1.0 / np.sqrt(fan_in)
            return jax.random.uniform(k, shape, jnp.float32, -s, s)

        params.append({
            "w1": u(keys[0], (cout, cin, 3), cin * 3), "b1": u(keys[1], (cout,), cin * 3),
            "w2": u(keys[2], (cout, cout, 3), cout * 3), "b2": u(keys[3], (cout,), cout * 3),
            "w3": u(keys[4], (cout, cin, 3), cin * 3), "b3": u(keys[5], (cout,), cin * 3),
        })
    return params


# ----------------------------------------------------------------------------
# Pure-JAX reference (mirrors PyTorch; operands cast to the kernel's MXU dtype)
# ----------------------------------------------------------------------------
def _ref_conv1d(x_ncl, w, b, dt):
    y = lax.conv_general_dilated(
        x_ncl.astype(dt), jnp.asarray(w, dt), window_strides=(1,), padding=[(1, 1)],
        dimension_numbers=("NCH", "OIH", "NCH"), preferred_element_type=jnp.float32)
    return y + jnp.asarray(b, dt).astype(jnp.float32)[None, :, None]


def _ref_silu(x):
    return x * jax.nn.sigmoid(x)


def _ref_block(x_ncl, p, dt):
    h = _ref_silu(_ref_conv1d(x_ncl, p["w1"], p["b1"], dt))
    h = _ref_silu(_ref_conv1d(h, p["w2"], p["b2"], dt))
    return h + _ref_conv1d(x_ncl, p["w3"], p["b3"], dt)


def _ref_encoder(x_ncl, block_params, dt):
    ftrs, x = [], x_ncl
    for p in block_params:
        x = _ref_block(x, p, dt)
        ftrs.append(x)
        N, C, L = x.shape
        x = jnp.max(x.reshape(N, C, L // 2, 2), axis=-1)   # MaxPool1d(2)
    return ftrs


# ----------------------------------------------------------------------------
if __name__ == "__main__":
    key = jax.random.PRNGKey(0)
    chs = (4, 8, 16)            # Encoder(chs) -> 2 blocks: 4->8, 8->16
    N, L = 2, 16                # input length must survive the pools

    kx, kp = jax.random.split(key)
    x = jax.random.normal(kx, (N, chs[0], L), dtype=jnp.float32)   # NCL like PyTorch
    params = init_params(kp, chs)

    mxu_dt = _select_mxu_dtype()
    ftrs = encoder_forward(x, params, mxu_dtype=mxu_dt)
    ftrs = [jax.block_until_ready(f) for f in ftrs]

    refs = _ref_encoder(x, params, mxu_dt)
    tol = 1e-3 if mxu_dt == jnp.float32 else 2e-2
    for f, r in zip(ftrs, refs):
        assert f.shape == r.shape, (f.shape, r.shape)
        np.testing.assert_allclose(np.asarray(f), np.asarray(r), rtol=tol, atol=tol)

    print("KERNEL_OK")
</pallas_src>

<mosaic_0001>
module attributes {stable_mosaic.version = 11 : i64} {
  func.func @kernel(%arg0: i32, %arg1: memref<32x4xf32, #tpu.memory_space<vmem>>, %arg2: memref<136x32xf32, #tpu.memory_space<vmem>>, %arg3: memref<32x8xf32, #tpu.memory_space<vmem>>, %arg4: memref<16x16xf32, #tpu.memory_space<vmem>>) attributes {dimension_semantics = [#tpu.dimension_semantics<parallel>], iteration_bounds = array<i64: 1>, scalar_prefetch = 0 : i64, scratch_operands = 0 : i64, tpu.core_type = #tpu.core_type<tc>, window_params = [{transform_indices = @transform_0, window_bounds = array<i64: 32, 4>}, {pipeline_mode = #tpu.pipeline_mode<synchronous>, transform_indices = @transform_1, window_bounds = array<i64: 136, 32>}, {transform_indices = @transform_2, window_bounds = array<i64: 32, 8>}, {transform_indices = @transform_3, window_bounds = array<i64: 16, 16>}]} {
    %c0 = arith.constant 0 : index
    %c0_0 = arith.constant 0 : index
    %0 = vector.load %arg1[%c0, %c0_0] : memref<32x4xf32, #tpu.memory_space<vmem>>, vector<32x4xf32>
    %1 = tpu.iota {dimensions = array<i32: 0>} : vector<32x1xi32>
    %c0_i32 = arith.constant 0 : i32
    %2 = vector.broadcast %c0_i32 : i32 to vector<32x1xi32>
    %3 = arith.cmpi eq, %1, %2 : vector<32x1xi32>
    %c15_i32 = arith.constant 15 : i32
    %4 = vector.broadcast %c15_i32 : i32 to vector<32x1xi32>
    %5 = arith.cmpi eq, %1, %4 : vector<32x1xi32>
    %c16_i32 = arith.constant 16 : i32
    %6 = vector.broadcast %c16_i32 : i32 to vector<32x1xi32>
    %7 = arith.cmpi eq, %1, %6 : vector<32x1xi32>
    %8 = arith.ori %3, %7 : vector<32x1xi1>
    %c31_i32 = arith.constant 31 : i32
    %9 = vector.broadcast %c31_i32 : i32 to vector<32x1xi32>
    %10 = arith.cmpi eq, %1, %9 : vector<32x1xi32>
    %11 = arith.ori %5, %10 : vector<32x1xi1>
    %c1_i32 = arith.constant 1 : i32
    %12 = tpu.dynamic_rotate %0 by %c1_i32 dim 0 : vector<32x4xf32>, i32 -> vector<32x4xf32>
    %cst = arith.constant 0.000000e+00 : f32
    %13 = vector.shape_cast %8 : vector<32x1xi1> to vector<32x1xi1>
    %14 = vector.broadcast %13 : vector<32x1xi1> to vector<32x4xi1>
    %15 = vector.broadcast %cst : f32 to vector<32x4xf32>
    %16 = arith.select %14, %15, %12 : vector<32x4xi1>, vector<32x4xf32>
    %c31_i32_1 = arith.constant 31 : i32
    %17 = tpu.dynamic_rotate %0 by %c31_i32_1 dim 0 : vector<32x4xf32>, i32 -> vector<32x4xf32>
    %cst_2 = arith.constant 0.000000e+00 : f32
    %18 = vector.shape_cast %11 : vector<32x1xi1> to vector<32x1xi1>
    %19 = vector.broadcast %18 : vector<32x1xi1> to vector<32x4xi1>
    %20 = vector.broadcast %cst_2 : f32 to vector<32x4xf32>
    %21 = arith.select %19, %20, %17 : vector<32x4xi1>, vector<32x4xf32>
    %cst_3 = arith.constant 1.000000e+00 : f32
    %22 = vector.broadcast %cst_3 : f32 to vector<32x1xf32>
    %23 = tpu.concatenate %16, %0, %21, %22 in 1 : vector<32x4xf32>, vector<32x4xf32>, vector<32x4xf32>, vector<32x1xf32> -> vector<32x13xf32>
    %c0_4 = arith.constant 0 : index
    %c0_5 = arith.constant 0 : index
    %24 = vector.load %arg2[%c0_4, %c0_5] : memref<136x32xf32, #tpu.memory_space<vmem>>, vector<13x16xf32>
    %cst_6 = arith.constant dense<0.000000e+00> : vector<32x16xf32>
    %25 = tpu.matmul %23, %24, %cst_6 {dimension_numbers = #tpu.dot_dimension_numbers<[1], [0], [0], [1], [0, 0, 1, 1], [], []>} : vector<32x13xf32>, vector<13x16xf32>, vector<32x16xf32> -> vector<32x16xf32>
    %26 = vector.extract_strided_slice %25 {offsets = [0, 0], sizes = [32, 8], strides = [1, 1]} : vector<32x16xf32> to vector<32x8xf32>
    %27 = arith.negf %26 : vector<32x8xf32>
    %28 = math.exp %27 : vector<32x8xf32>
    %cst_7 = arith.constant 1.000000e+00 : f32
    %29 = vector.broadcast %cst_7 : f32 to vector<32x8xf32>
    %30 = arith.addf %29, %28 : vector<32x8xf32>
    %31 = arith.divf %29, %30 : vector<32x8xf32>
    %32 = arith.mulf %26, %31 : vector<32x8xf32>
    %33 = vector.extract_strided_slice %25 {offsets = [0, 8], sizes = [32, 8], strides = [1, 1]} : vector<32x16xf32> to vector<32x8xf32>
    %c1_i32_8 = arith.constant 1 : i32
    %34 = tpu.dynamic_rotate %32 by %c1_i32_8 dim 0 : vector<32x8xf32>, i32 -> vector<32x8xf32>
    %cst_9 = arith.constant 0.000000e+00 : f32
    %35 = vector.shape_cast %8 : vector<32x1xi1> to vector<32x1xi1>
    %36 = vector.broadcast %35 : vector<32x1xi1> to vector<32x8xi1>
    %37 = vector.broadcast %cst_9 : f32 to vector<32x8xf32>
    %38 = arith.select %36, %37, %34 : vector<32x8xi1>, vector<32x8xf32>
    %c31_i32_10 = arith.constant 31 : i32
    %39 = tpu.dynamic_rotate %32 by %c31_i32_10 dim 0 : vector<32x8xf32>, i32 -> vector<32x8xf32>
    %cst_11 = arith.constant 0.000000e+00 : f32
    %40 = vector.shape_cast %11 : vector<32x1xi1> to vector<32x1xi1>
    %41 = vector.broadcast %40 : vector<32x1xi1> to vector<32x8xi1>
    %42 = vector.broadcast %cst_11 : f32 to vector<32x8xf32>
    %43 = arith.select %41, %42, %39 : vector<32x8xi1>, vector<32x8xf32>
    %cst_12 = arith.constant 1.000000e+00 : f32
    %44 = vector.broadcast %cst_12 : f32 to vector<32x1xf32>
    %45 = tpu.concatenate %38, %32, %43, %44 in 1 : vector<32x8xf32>, vector<32x8xf32>, vector<32x8xf32>, vector<32x1xf32> -> vector<32x25xf32>
    %c16 = arith.constant 16 : index
    %c0_13 = arith.constant 0 : index
    %46 = vector.load %arg2[%c16, %c0_13] : memref<136x32xf32, #tpu.memory_space<vmem>>, vector<25x8xf32>
    %cst_14 = arith.constant dense<0.000000e+00> : vector<32x8xf32>
    %47 = tpu.matmul %45, %46, %cst_14 {dimension_numbers = #tpu.dot_dimension_numbers<[1], [0], [0], [1], [0, 0, 1, 1], [], []>} : vector<32x25xf32>, vector<25x8xf32>, vector<32x8xf32> -> vector<32x8xf32>
    %48 = arith.negf %47 : vector<32x8xf32>
    %49 = math.exp %48 : vector<32x8xf32>
    %cst_15 = arith.constant 1.000000e+00 : f32
    %50 = vector.broadcast %cst_15 : f32 to vector<32x8xf32>
    %51 = arith.addf %50, %49 : vector<32x8xf32>
    %52 = arith.divf %50, %51 : vector<32x8xf32>
    %53 = arith.mulf %47, %52 : vector<32x8xf32>
    %54 = arith.addf %53, %33 : vector<32x8xf32>
    %c0_16 = arith.constant 0 : index
    %c0_17 = arith.constant 0 : index
    %55 = vector.load %arg3[%c0_16, %c0_17] : memref<32x8xf32, #tpu.memory_space<vmem>>, vector<32x8xf32>
    tpu.vector_store %arg3[%c0_16, %c0_17], %54 {strides = array<i32>} : memref<32x8xf32, #tpu.memory_space<vmem>>, vector<32x8xf32>,
    %c0_18 = arith.constant 0 : index
    %c0_19 = arith.constant 0 : index
    %56 = tpu.strided_load %arg3[%c0_18, %c0_19] {strides = array<i32: 2, 1>} : memref<32x8xf32, #tpu.memory_space<vmem>>, vector<16x8xf32>
    %c1 = arith.constant 1 : index
    %c0_20 = arith.constant 0 : index
    %57 = tpu.strided_load %arg3[%c1, %c0_20] {strides = array<i32: 2, 1>} : memref<32x8xf32, #tpu.memory_space<vmem>>, vector<16x8xf32>
    %58 = arith.maximumf %56, %57 : vector<16x8xf32>
    %59 = tpu.iota {dimensions = array<i32: 0>} : vector<16x1xi32>
    %c0_i32_21 = arith.constant 0 : i32
    %60 = vector.broadcast %c0_i32_21 : i32 to vector<16x1xi32>
    %61 = arith.cmpi eq, %59, %60 : vector<16x1xi32>
    %c7_i32 = arith.constant 7 : i32
    %62 = vector.broadcast %c7_i32 : i32 to vector<16x1xi32>
    %63 = arith.cmpi eq, %59, %62 : vector<16x1xi32>
    %c8_i32 = arith.constant 8 : i32
    %64 = vector.broadcast %c8_i32 : i32 to vector<16x1xi32>
    %65 = arith.cmpi eq, %59, %64 : vector<16x1xi32>
    %66 = arith.ori %61, %65 : vector<16x1xi1>
    %c15_i32_22 = arith.constant 15 : i32
    %67 = vector.broadcast %c15_i32_22 : i32 to vector<16x1xi32>
    %68 = arith.cmpi eq, %59, %67 : vector<16x1xi32>
    %69 = arith.ori %63, %68 : vector<16x1xi1>
    %c1_i32_23 = arith.constant 1 : i32
    %70 = tpu.dynamic_rotate %58 by %c1_i32_23 dim 0 : vector<16x8xf32>, i32 -> vector<16x8xf32>
    %cst_24 = arith.constant 0.000000e+00 : f32
    %71 = vector.shape_cast %66 : vector<16x1xi1> to vector<16x1xi1>
    %72 = vector.broadcast %71 : vector<16x1xi1> to vector<16x8xi1>
    %73 = vector.broadcast %cst_24 : f32 to vector<16x8xf32>
    %74 = arith.select %72, %73, %70 : vector<16x8xi1>, vector<16x8xf32>
    %c15_i32_25 = arith.constant 15 : i32
    %75 = tpu.dynamic_rotate %58 by %c15_i32_25 dim 0 : vector<16x8xf32>, i32 -> vector<16x8xf32>
    %cst_26 = arith.constant 0.000000e+00 : f32
    %76 = vector.shape_cast %69 : vector<16x1xi1> to vector<16x1xi1>
    %77 = vector.broadcast %76 : vector<16x1xi1> to vector<16x8xi1>
    %78 = vector.broadcast %cst_26 : f32 to vector<16x8xf32>
    %79 = arith.select %77, %78, %75 : vector<16x8xi1>, vector<16x8xf32>
    %cst_27 = arith.constant 1.000000e+00 : f32
    %80 = vector.broadcast %cst_27 : f32 to vector<16x1xf32>
    %81 = tpu.concatenate %74, %58, %79, %80 in 1 : vector<16x8xf32>, vector<16x8xf32>, vector<16x8xf32>, vector<16x1xf32> -> vector<16x25xf32>
    %c48 = arith.constant 48 : index
    %c0_28 = arith.constant 0 : index
    %82 = vector.load %arg2[%c48, %c0_28] : memref<136x32xf32, #tpu.memory_space<vmem>>, vector<25x32xf32>
    %cst_29 = arith.constant dense<0.000000e+00> : vector<16x32xf32>
    %83 = tpu.matmul %81, %82, %cst_29 {dimension_numbers = #tpu.dot_dimension_numbers<[1], [0], [0], [1], [0, 0, 1, 1], [], []>} : vector<16x25xf32>, vector<25x32xf32>, vector<16x32xf32> -> vector<16x32xf32>
    %84 = vector.extract_strided_slice %83 {offsets = [0, 0], sizes = [16, 16], strides = [1, 1]} : vector<16x32xf32> to vector<16x16xf32>
    %85 = arith.negf %84 : vector<16x16xf32>
    %86 = math.exp %85 : vector<16x16xf32>
    %cst_30 = arith.constant 1.000000e+00 : f32
    %87 = vector.broadcast %cst_30 : f32 to vector<16x16xf32>
    %88 = arith.addf %87, %86 : vector<16x16xf32>
    %89 = arith.divf %87, %88 : vector<16x16xf32>
    %90 = arith.mulf %84, %89 : vector<16x16xf32>
    %91 = vector.extract_strided_slice %83 {offsets = [0, 16], sizes = [16, 16], strides = [1, 1]} : vector<16x32xf32> to vector<16x16xf32>
    %c1_i32_31 = arith.constant 1 : i32
    %92 = tpu.dynamic_rotate %90 by %c1_i32_31 dim 0 : vector<16x16xf32>, i32 -> vector<16x16xf32>
    %cst_32 = arith.constant 0.000000e+00 : f32
    %93 = vector.shape_cast %66 : vector<16x1xi1> to vector<16x1xi1>
    %94 = vector.broadcast %93 : vector<16x1xi1> to vector<16x16xi1>
    %95 = vector.broadcast %cst_32 : f32 to vector<16x16xf32>
    %96 = arith.select %94, %95, %92 : vector<16x16xi1>, vector<16x16xf32>
    %c15_i32_33 = arith.constant 15 : i32
    %97 = tpu.dynamic_rotate %90 by %c15_i32_33 dim 0 : vector<16x16xf32>, i32 -> vector<16x16xf32>
    %cst_34 = arith.constant 0.000000e+00 : f32
    %98 = vector.shape_cast %69 : vector<16x1xi1> to vector<16x1xi1>
    %99 = vector.broadcast %98 : vector<16x1xi1> to vector<16x16xi1>
    %100 = vector.broadcast %cst_34 : f32 to vector<16x16xf32>
    %101 = arith.select %99, %100, %97 : vector<16x16xi1>, vector<16x16xf32>
    %cst_35 = arith.constant 1.000000e+00 : f32
    %102 = vector.broadcast %cst_35 : f32 to vector<16x1xf32>
    %103 = tpu.concatenate %96, %90, %101, %102 in 1 : vector<16x16xf32>, vector<16x16xf32>, vector<16x16xf32>, vector<16x1xf32> -> vector<16x49xf32>
    %c80 = arith.constant 80 : index
    %c0_36 = arith.constant 0 : index
    %104 = vector.load %arg2[%c80, %c0_36] : memref<136x32xf32, #tpu.memory_space<vmem>>, vector<49x16xf32>
    %cst_37 = arith.constant dense<0.000000e+00> : vector<16x16xf32>
    %105 = tpu.matmul %103, %104, %cst_37 {dimension_numbers = #tpu.dot_dimension_numbers<[1], [0], [0], [1], [0, 0, 1, 1], [], []>} : vector<16x49xf32>, vector<49x16xf32>, vector<16x16xf32> -> vector<16x16xf32>
    %106 = arith.negf %105 : vector<16x16xf32>
    %107 = math.exp %106 : vector<16x16xf32>
    %cst_38 = arith.constant 1.000000e+00 : f32
    %108 = vector.broadcast %cst_38 : f32 to vector<16x16xf32>
    %109 = arith.addf %108, %107 : vector<16x16xf32>
    %110 = arith.divf %108, %109 : vector<16x16xf32>
    %111 = arith.mulf %105, %110 : vector<16x16xf32>
    %112 = arith.addf %111, %91 : vector<16x16xf32>
    %c0_39 = arith.constant 0 : index
    %c0_40 = arith.constant 0 : index
    %113 = vector.load %arg4[%c0_39, %c0_40] : memref<16x16xf32, #tpu.memory_space<vmem>>, vector<16x16xf32>
    tpu.vector_store %arg4[%c0_39, %c0_40], %112 {strides = array<i32>} : memref<16x16xf32, #tpu.memory_space<vmem>>, vector<16x16xf32>,
    return
  }
  func.func @transform_0(%arg0: i32) -> (i32, i32) {
    %c0_i32 = arith.constant 0 : i32
    %c0_i32_0 = arith.constant 0 : i32
    return %arg0, %c0_i32 : i32, i32
  }
  func.func @transform_1(%arg0: i32) -> (i32, i32) {
    %c0_i32 = arith.constant 0 : i32
    %c0_i32_0 = arith.constant 0 : i32
    %c0_i32_1 = arith.constant 0 : i32
    return %c0_i32, %c0_i32_0 : i32, i32
  }
  func.func @transform_2(%arg0: i32) -> (i32, i32) {
    %c0_i32 = arith.constant 0 : i32
    %c0_i32_0 = arith.constant 0 : i32
    return %arg0, %c0_i32 : i32, i32
  }
  func.func @transform_3(%arg0: i32) -> (i32, i32) {
    %c0_i32 = arith.constant 0 : i32
    %c0_i32_0 = arith.constant 0 : i32
    return %arg0, %c0_i32 : i32, i32
  }
}

module attributes {stable_mosaic.version = 11 : i64} {
  func.func @kernel(%arg0: i32, %arg1: memref<32x4xf32, #tpu.memory_space<vmem>>, %arg2: memref<136x32xf32, #tpu.memory_space<vmem>>, %arg3: memref<32x8xf32, #tpu.memory_space<vmem>>, %arg4: memref<16x16xf32, #tpu.memory_space<vmem>>) attributes {dimension_semantics = [#tpu.dimension_semantics<parallel>], iteration_bounds = array<i64: 1>, scalar_prefetch = 0 : i64, scratch_operands = 0 : i64, tpu.core_type = #tpu.core_type<tc>, window_params = [{transform_indices = @transform_0, window_bounds = array<i64: 32, 4>}, {pipeline_mode = #tpu.pipeline_mode<synchronous>, transform_indices = @transform_1, window_bounds = array<i64: 136, 32>}, {transform_indices = @transform_2, window_bounds = array<i64: 32, 8>}, {transform_indices = @transform_3, window_bounds = array<i64: 16, 16>}]} {
    %c0 = arith.constant 0 : index
    %c0_0 = arith.constant 0 : index
    %0 = vector.load %arg1[%c0, %c0_0] : memref<32x4xf32, #tpu.memory_space<vmem>>, vector<32x4xf32>
    %1 = tpu.iota {dimensions = array<i32: 0>} : vector<32x1xi32>
    %c0_i32 = arith.constant 0 : i32
    %2 = vector.broadcast %c0_i32 : i32 to vector<32x1xi32>
    %3 = arith.cmpi eq, %1, %2 : vector<32x1xi32>
    %c15_i32 = arith.constant 15 : i32
    %4 = vector.broadcast %c15_i32 : i32 to vector<32x1xi32>
    %5 = arith.cmpi eq, %1, %4 : vector<32x1xi32>
    %c16_i32 = arith.constant 16 : i32
    %6 = vector.broadcast %c16_i32 : i32 to vector<32x1xi32>
    %7 = arith.cmpi eq, %1, %6 : vector<32x1xi32>
    %8 = arith.ori %3, %7 : vector<32x1xi1>
    %c31_i32 = arith.constant 31 : i32
    %9 = vector.broadcast %c31_i32 : i32 to vector<32x1xi32>
    %10 = arith.cmpi eq, %1, %9 : vector<32x1xi32>
    %11 = arith.ori %5, %10 : vector<32x1xi1>
    %c1_i32 = arith.constant 1 : i32
    %12 = tpu.dynamic_rotate %0 by %c1_i32 dim 0 : vector<32x4xf32>, i32 -> vector<32x4xf32>
    %cst = arith.constant 0.000000e+00 : f32
    %13 = vector.shape_cast %8 : vector<32x1xi1> to vector<32x1xi1>
    %14 = vector.broadcast %13 : vector<32x1xi1> to vector<32x4xi1>
    %15 = vector.broadcast %cst : f32 to vector<32x4xf32>
    %16 = arith.select %14, %15, %12 : vector<32x4xi1>, vector<32x4xf32>
    %c31_i32_1 = arith.constant 31 : i32
    %17 = tpu.dynamic_rotate %0 by %c31_i32_1 dim 0 : vector<32x4xf32>, i32 -> vector<32x4xf32>
    %cst_2 = arith.constant 0.000000e+00 : f32
    %18 = vector.shape_cast %11 : vector<32x1xi1> to vector<32x1xi1>
    %19 = vector.broadcast %18 : vector<32x1xi1> to vector<32x4xi1>
    %20 = vector.broadcast %cst_2 : f32 to vector<32x4xf32>
    %21 = arith.select %19, %20, %17 : vector<32x4xi1>, vector<32x4xf32>
    %c0_3 = arith.constant 0 : index
    %c0_4 = arith.constant 0 : index
    %22 = vector.load %arg2[%c0_3, %c0_4] : memref<136x32xf32, #tpu.memory_space<vmem>>, vector<4x16xf32>
    %cst_5 = arith.constant dense<0.000000e+00> : vector<32x16xf32>
    %23 = tpu.matmul %16, %22, %cst_5 {dimension_numbers = #tpu.dot_dimension_numbers<[1], [0], [0], [1], [0, 0, 1, 1], [], []>} : vector<32x4xf32>, vector<4x16xf32>, vector<32x16xf32> -> vector<32x16xf32>
    %c4 = arith.constant 4 : index
    %c0_6 = arith.constant 0 : index
    %24 = vector.load %arg2[%c4, %c0_6] : memref<136x32xf32, #tpu.memory_space<vmem>>, vector<4x16xf32>
    %cst_7 = arith.constant dense<0.000000e+00> : vector<32x16xf32>
    %25 = tpu.matmul %0, %24, %cst_7 {dimension_numbers = #tpu.dot_dimension_numbers<[1], [0], [0], [1], [0, 0, 1, 1], [], []>} : vector<32x4xf32>, vector<4x16xf32>, vector<32x16xf32> -> vector<32x16xf32>
    %26 = arith.addf %23, %25 : vector<32x16xf32>
    %c8 = arith.constant 8 : index
    %c0_8 = arith.constant 0 : index
    %27 = vector.load %arg2[%c8, %c0_8] : memref<136x32xf32, #tpu.memory_space<vmem>>, vector<4x16xf32>
    %cst_9 = arith.constant dense<0.000000e+00> : vector<32x16xf32>
    %28 = tpu.matmul %21, %27, %cst_9 {dimension_numbers = #tpu.dot_dimension_numbers<[1], [0], [0], [1], [0, 0, 1, 1], [], []>} : vector<32x4xf32>, vector<4x16xf32>, vector<32x16xf32> -> vector<32x16xf32>
    %29 = arith.addf %26, %28 : vector<32x16xf32>
    %c12 = arith.constant 12 : index
    %c0_10 = arith.constant 0 : index
    %30 = vector.load %arg2[%c12, %c0_10] : memref<136x32xf32, #tpu.memory_space<vmem>>, vector<1x16xf32>
    %31 = vector.broadcast %30 : vector<1x16xf32> to vector<32x16xf32>
    %32 = arith.addf %29, %31 : vector<32x16xf32>
    %33 = vector.extract_strided_slice %32 {offsets = [0, 0], sizes = [32, 8], strides = [1, 1]} : vector<32x16xf32> to vector<32x8xf32>
    %34 = arith.negf %33 : vector<32x8xf32>
    %35 = math.exp %34 : vector<32x8xf32>
    %cst_11 = arith.constant 1.000000e+00 : f32
    %36 = vector.broadcast %cst_11 : f32 to vector<32x8xf32>
    %37 = arith.addf %36, %35 : vector<32x8xf32>
    %38 = arith.divf %36, %37 : vector<32x8xf32>
    %39 = arith.mulf %33, %38 : vector<32x8xf32>
    %40 = vector.extract_strided_slice %32 {offsets = [0, 8], sizes = [32, 8], strides = [1, 1]} : vector<32x16xf32> to vector<32x8xf32>
    %c1_i32_12 = arith.constant 1 : i32
    %41 = tpu.dynamic_rotate %39 by %c1_i32_12 dim 0 : vector<32x8xf32>, i32 -> vector<32x8xf32>
    %cst_13 = arith.constant 0.000000e+00 : f32
    %42 = vector.shape_cast %8 : vector<32x1xi1> to vector<32x1xi1>
    %43 = vector.broadcast %42 : vector<32x1xi1> to vector<32x8xi1>
    %44 = vector.broadcast %cst_13 : f32 to vector<32x8xf32>
    %45 = arith.select %43, %44, %41 : vector<32x8xi1>, vector<32x8xf32>
    %c31_i32_14 = arith.constant 31 : i32
    %46 = tpu.dynamic_rotate %39 by %c31_i32_14 dim 0 : vector<32x8xf32>, i32 -> vector<32x8xf32>
    %cst_15 = arith.constant 0.000000e+00 : f32
    %47 = vector.shape_cast %11 : vector<32x1xi1> to vector<32x1xi1>
    %48 = vector.broadcast %47 : vector<32x1xi1> to vector<32x8xi1>
    %49 = vector.broadcast %cst_15 : f32 to vector<32x8xf32>
    %50 = arith.select %48, %49, %46 : vector<32x8xi1>, vector<32x8xf32>
    %c16 = arith.constant 16 : index
    %c0_16 = arith.constant 0 : index
    %51 = vector.load %arg2[%c16, %c0_16] : memref<136x32xf32, #tpu.memory_space<vmem>>, vector<8x8xf32>
    %cst_17 = arith.constant dense<0.000000e+00> : vector<32x8xf32>
    %52 = tpu.matmul %45, %51, %cst_17 {dimension_numbers = #tpu.dot_dimension_numbers<[1], [0], [0], [1], [0, 0, 1, 1], [], []>} : vector<32x8xf32>, vector<8x8xf32>, vector<32x8xf32> -> vector<32x8xf32>
    %c24 = arith.constant 24 : index
    %c0_18 = arith.constant 0 : index
    %53 = vector.load %arg2[%c24, %c0_18] : memref<136x32xf32, #tpu.memory_space<vmem>>, vector<8x8xf32>
    %cst_19 = arith.constant dense<0.000000e+00> : vector<32x8xf32>
    %54 = tpu.matmul %39, %53, %cst_19 {dimension_numbers = #tpu.dot_dimension_numbers<[1], [0], [0], [1], [0, 0, 1, 1], [], []>} : vector<32x8xf32>, vector<8x8xf32>, vector<32x8xf32> -> vector<32x8xf32>
    %55 = arith.addf %52, %54 : vector<32x8xf32>
    %c32 = arith.constant 32 : index
    %c0_20 = arith.constant 0 : index
    %56 = vector.load %arg2[%c32, %c0_20] : memref<136x32xf32, #tpu.memory_space<vmem>>, vector<8x8xf32>
    %cst_21 = arith.constant dense<0.000000e+00> : vector<32x8xf32>
    %57 = tpu.matmul %50, %56, %cst_21 {dimension_numbers = #tpu.dot_dimension_numbers<[1], [0], [0], [1], [0, 0, 1, 1], [], []>} : vector<32x8xf32>, vector<8x8xf32>, vector<32x8xf32> -> vector<32x8xf32>
    %58 = arith.addf %55, %57 : vector<32x8xf32>
    %c40 = arith.constant 40 : index
    %c0_22 = arith.constant 0 : index
    %59 = vector.load %arg2[%c40, %c0_22] : memref<136x32xf32, #tpu.memory_space<vmem>>, vector<1x8xf32>
    %60 = vector.broadcast %59 : vector<1x8xf32> to vector<32x8xf32>
    %61 = arith.addf %58, %60 : vector<32x8xf32>
    %62 = arith.negf %61 : vector<32x8xf32>
    %63 = math.exp %62 : vector<32x8xf32>
    %cst_23 = arith.constant 1.000000e+00 : f32
    %64 = vector.broadcast %cst_23 : f32 to vector<32x8xf32>
    %65 = arith.addf %64, %63 : vector<32x8xf32>
    %66 = arith.divf %64, %65 : vector<32x8xf32>
    %67 = arith.mulf %61, %66 : vector<32x8xf32>
    %68 = arith.addf %67, %40 : vector<32x8xf32>
    %c0_24 = arith.constant 0 : index
    %c0_25 = arith.constant 0 : index
    %69 = vector.load %arg3[%c0_24, %c0_25] : memref<32x8xf32, #tpu.memory_space<vmem>>, vector<32x8xf32>
    tpu.vector_store %arg3[%c0_24, %c0_25], %68 {strides = array<i32>} : memref<32x8xf32, #tpu.memory_space<vmem>>, vector<32x8xf32>,
    %c0_26 = arith.constant 0 : index
    %c0_27 = arith.constant 0 : index
    %70 = tpu.strided_load %arg3[%c0_26, %c0_27] {strides = array<i32: 2, 1>} : memref<32x8xf32, #tpu.memory_space<vmem>>, vector<16x8xf32>
    %c1 = arith.constant 1 : index
    %c0_28 = arith.constant 0 : index
    %71 = tpu.strided_load %arg3[%c1, %c0_28] {strides = array<i32: 2, 1>} : memref<32x8xf32, #tpu.memory_space<vmem>>, vector<16x8xf32>
    %72 = arith.maximumf %70, %71 : vector<16x8xf32>
    %73 = tpu.iota {dimensions = array<i32: 0>} : vector<16x1xi32>
    %c0_i32_29 = arith.constant 0 : i32
    %74 = vector.broadcast %c0_i32_29 : i32 to vector<16x1xi32>
    %75 = arith.cmpi eq, %73, %74 : vector<16x1xi32>
    %c7_i32 = arith.constant 7 : i32
    %76 = vector.broadcast %c7_i32 : i32 to vector<16x1xi32>
    %77 = arith.cmpi eq, %73, %76 : vector<16x1xi32>
    %c8_i32 = arith.constant 8 : i32
    %78 = vector.broadcast %c8_i32 : i32 to vector<16x1xi32>
    %79 = arith.cmpi eq, %73, %78 : vector<16x1xi32>
    %80 = arith.ori %75, %79 : vector<16x1xi1>
    %c15_i32_30 = arith.constant 15 : i32
    %81 = vector.broadcast %c15_i32_30 : i32 to vector<16x1xi32>
    %82 = arith.cmpi eq, %73, %81 : vector<16x1xi32>
    %83 = arith.ori %77, %82 : vector<16x1xi1>
    %c1_i32_31 = arith.constant 1 : i32
    %84 = tpu.dynamic_rotate %72 by %c1_i32_31 dim 0 : vector<16x8xf32>, i32 -> vector<16x8xf32>
    %cst_32 = arith.constant 0.000000e+00 : f32
    %85 = vector.shape_cast %80 : vector<16x1xi1> to vector<16x1xi1>
    %86 = vector.broadcast %85 : vector<16x1xi1> to vector<16x8xi1>
    %87 = vector.broadcast %cst_32 : f32 to vector<16x8xf32>
    %88 = arith.select %86, %87, %84 : vector<16x8xi1>, vector<16x8xf32>
    %c15_i32_33 = arith.constant 15 : i32
    %89 = tpu.dynamic_rotate %72 by %c15_i32_33 dim 0 : vector<16x8xf32>, i32 -> vector<16x8xf32>
    %cst_34 = arith.constant 0.000000e+00 : f32
    %90 = vector.shape_cast %83 : vector<16x1xi1> to vector<16x1xi1>
    %91 = vector.broadcast %90 : vector<16x1xi1> to vector<16x8xi1>
    %92 = vector.broadcast %cst_34 : f32 to vector<16x8xf32>
    %93 = arith.select %91, %92, %89 : vector<16x8xi1>, vector<16x8xf32>
    %c48 = arith.constant 48 : index
    %c0_35 = arith.constant 0 : index
    %94 = vector.load %arg2[%c48, %c0_35] : memref<136x32xf32, #tpu.memory_space<vmem>>, vector<8x32xf32>
    %cst_36 = arith.constant dense<0.000000e+00> : vector<16x32xf32>
    %95 = tpu.matmul %88, %94, %cst_36 {dimension_numbers = #tpu.dot_dimension_numbers<[1], [0], [0], [1], [0, 0, 1, 1], [], []>} : vector<16x8xf32>, vector<8x32xf32>, vector<16x32xf32> -> vector<16x32xf32>
    %c56 = arith.constant 56 : index
    %c0_37 = arith.constant 0 : index
    %96 = vector.load %arg2[%c56, %c0_37] : memref<136x32xf32, #tpu.memory_space<vmem>>, vector<8x32xf32>
    %cst_38 = arith.constant dense<0.000000e+00> : vector<16x32xf32>
    %97 = tpu.matmul %72, %96, %cst_38 {dimension_numbers = #tpu.dot_dimension_numbers<[1], [0], [0], [1], [0, 0, 1, 1], [], []>} : vector<16x8xf32>, vector<8x32xf32>, vector<16x32xf32> -> vector<16x32xf32>
    %98 = arith.addf %95, %97 : vector<16x32xf32>
    %c64 = arith.constant 64 : index
    %c0_39 = arith.constant 0 : index
    %99 = vector.load %arg2[%c64, %c0_39] : memref<136x32xf32, #tpu.memory_space<vmem>>, vector<8x32xf32>
    %cst_40 = arith.constant dense<0.000000e+00> : vector<16x32xf32>
    %100 = tpu.matmul %93, %99, %cst_40 {dimension_numbers = #tpu.dot_dimension_numbers<[1], [0], [0], [1], [0, 0, 1, 1], [], []>} : vector<16x8xf32>, vector<8x32xf32>, vector<16x32xf32> -> vector<16x32xf32>
    %101 = arith.addf %98, %100 : vector<16x32xf32>
    %c72 = arith.constant 72 : index
    %c0_41 = arith.constant 0 : index
    %102 = vector.load %arg2[%c72, %c0_41] : memref<136x32xf32, #tpu.memory_space<vmem>>, vector<1x32xf32>
    %103 = vector.broadcast %102 : vector<1x32xf32> to vector<16x32xf32>
    %104 = arith.addf %101, %103 : vector<16x32xf32>
    %105 = vector.extract_strided_slice %104 {offsets = [0, 0], sizes = [16, 16], strides = [1, 1]} : vector<16x32xf32> to vector<16x16xf32>
    %106 = arith.negf %105 : vector<16x16xf32>
    %107 = math.exp %106 : vector<16x16xf32>
    %cst_42 = arith.constant 1.000000e+00 : f32
    %108 = vector.broadcast %cst_42 : f32 to vector<16x16xf32>
    %109 = arith.addf %108, %107 : vector<16x16xf32>
    %110 = arith.divf %108, %109 : vector<16x16xf32>
    %111 = arith.mulf %105, %110 : vector<16x16xf32>
    %112 = vector.extract_strided_slice %104 {offsets = [0, 16], sizes = [16, 16], strides = [1, 1]} : vector<16x32xf32> to vector<16x16xf32>
    %c1_i32_43 = arith.constant 1 : i32
    %113 = tpu.dynamic_rotate %111 by %c1_i32_43 dim 0 : vector<16x16xf32>, i32 -> vector<16x16xf32>
    %cst_44 = arith.constant 0.000000e+00 : f32
    %114 = vector.shape_cast %80 : vector<16x1xi1> to vector<16x1xi1>
    %115 = vector.broadcast %114 : vector<16x1xi1> to vector<16x16xi1>
    %116 = vector.broadcast %cst_44 : f32 to vector<16x16xf32>
    %117 = arith.select %115, %116, %113 : vector<16x16xi1>, vector<16x16xf32>
    %c15_i32_45 = arith.constant 15 : i32
    %118 = tpu.dynamic_rotate %111 by %c15_i32_45 dim 0 : vector<16x16xf32>, i32 -> vector<16x16xf32>
    %cst_46 = arith.constant 0.000000e+00 : f32
    %119 = vector.shape_cast %83 : vector<16x1xi1> to vector<16x1xi1>
    %120 = vector.broadcast %119 : vector<16x1xi1> to vector<16x16xi1>
    %121 = vector.broadcast %cst_46 : f32 to vector<16x16xf32>
    %122 = arith.select %120, %121, %118 : vector<16x16xi1>, vector<16x16xf32>
    %c80 = arith.constant 80 : index
    %c0_47 = arith.constant 0 : index
    %123 = vector.load %arg2[%c80, %c0_47] : memref<136x32xf32, #tpu.memory_space<vmem>>, vector<16x16xf32>
    %cst_48 = arith.constant dense<0.000000e+00> : vector<16x16xf32>
    %124 = tpu.matmul %117, %123, %cst_48 {dimension_numbers = #tpu.dot_dimension_numbers<[1], [0], [0], [1], [0, 0, 1, 1], [], []>} : vector<16x16xf32>, vector<16x16xf32>, vector<16x16xf32> -> vector<16x16xf32>
    %c96 = arith.constant 96 : index
    %c0_49 = arith.constant 0 : index
    %125 = vector.load %arg2[%c96, %c0_49] : memref<136x32xf32, #tpu.memory_space<vmem>>, vector<16x16xf32>
    %cst_50 = arith.constant dense<0.000000e+00> : vector<16x16xf32>
    %126 = tpu.matmul %111, %125, %cst_50 {dimension_numbers = #tpu.dot_dimension_numbers<[1], [0], [0], [1], [0, 0, 1, 1], [], []>} : vector<16x16xf32>, vector<16x16xf32>, vector<16x16xf32> -> vector<16x16xf32>
    %127 = arith.addf %124, %126 : vector<16x16xf32>
    %c112 = arith.constant 112 : index
    %c0_51 = arith.constant 0 : index
    %128 = vector.load %arg2[%c112, %c0_51] : memref<136x32xf32, #tpu.memory_space<vmem>>, vector<16x16xf32>
    %cst_52 = arith.constant dense<0.000000e+00> : vector<16x16xf32>
    %129 = tpu.matmul %122, %128, %cst_52 {dimension_numbers = #tpu.dot_dimension_numbers<[1], [0], [0], [1], [0, 0, 1, 1], [], []>} : vector<16x16xf32>, vector<16x16xf32>, vector<16x16xf32> -> vector<16x16xf32>
    %130 = arith.addf %127, %129 : vector<16x16xf32>
    %c128 = arith.constant 128 : index
    %c0_53 = arith.constant 0 : index
    %131 = vector.load %arg2[%c128, %c0_53] : memref<136x32xf32, #tpu.memory_space<vmem>>, vector<1x16xf32>
    %132 = vector.broadcast %131 : vector<1x16xf32> to vector<16x16xf32>
    %133 = arith.addf %130, %132 : vector<16x16xf32>
    %134 = arith.negf %133 : vector<16x16xf32>
    %135 = math.exp %134 : vector<16x16xf32>
    %cst_54 = arith.constant 1.000000e+00 : f32
    %136 = vector.broadcast %cst_54 : f32 to vector<16x16xf32>
    %137 = arith.addf %136, %135 : vector<16x16xf32>
    %138 = arith.divf %136, %137 : vector<16x16xf32>
    %139 = arith.mulf %133, %138 : vector<16x16xf32>
    %140 = arith.addf %139, %112 : vector<16x16xf32>
    %c0_55 = arith.constant 0 : index
    %c0_56 = arith.constant 0 : index
    %141 = vector.load %arg4[%c0_55, %c0_56] : memref<16x16xf32, #tpu.memory_space<vmem>>, vector<16x16xf32>
    tpu.vector_store %arg4[%c0_55, %c0_56], %140 {strides = array<i32>} : memref<16x16xf32, #tpu.memory_space<vmem>>, vector<16x16xf32>,
    return
  }
  func.func @transform_0(%arg0: i32) -> (i32, i32) {
    %c0_i32 = arith.constant 0 : i32
    %c0_i32_0 = arith.constant 0 : i32
    return %arg0, %c0_i32 : i32, i32
  }
  func.func @transform_1(%arg0: i32) -> (i32, i32) {
    %c0_i32 = arith.constant 0 : i32
    %c0_i32_0 = arith.constant 0 : i32
    %c0_i32_1 = arith.constant 0 : i32
    return %c0_i32, %c0_i32_0 : i32, i32
  }
  func.func @transform_2(%arg0: i32) -> (i32, i32) {
    %c0_i32 = arith.constant 0 : i32
    %c0_i32_0 = arith.constant 0 : i32
    return %arg0, %c0_i32 : i32, i32
  }
  func.func @transform_3(%arg0: i32) -> (i32, i32) {
    %c0_i32 = arith.constant 0 : i32
    %c0_i32_0 = arith.constant 0 : i32
    return %arg0, %c0_i32 : i32, i32
  }
}

</mosaic_0001>

<bundles_post_ra>
// kernel: tpu_custom_call.1
= control target key start
LH: loop header
LB: loop body
LE: loop exit
PB: predicated region body
PF: predicated region fallthrough
CT: control target
= control target key end

     0   :  { %v18_v3 = vlaneseq  ;;  %s1062_s18 = smov 4   ;;  %vm151_vm0 = vcmask 1044480   ;;  %s1397_s0 = inlined_call_operand.vmem [shape: f32[32,4], index: 0, kind: input, shape index: {}]   ;;  %s1398_s1 = inlined_call_operand.vmem [shape: f32[136,32], index: 1, kind: input, shape index: {}]   ;;  %s1399_s2 = inlined_call_operand.vmem [shape: f32[32,8], index: 2, kind: output, shape index: {0}]   ;;  %s1400_s3 = inlined_call_operand.hbm [shape: f32[16,16], index: 3, kind: output, shape index: {1}]  }
   0x1   :  { %v14_v0 = vld [vmem:[%s1397_s0] sm:$0xff]  ;;  %v17_v1 = vld [vmem:[%s1397_s0 + $0x18] sm:$0xff]  ;;  %v15_v2 = vld [vmem:[%s1397_s0 + $0x8] sm:$0xff] }
   0x2   :  { %93 = vrot.lane.b32.xlu0 %v14_v0, %s1062_s18  ;;  %v47_v4 = vrot.slane %v14_v0, 7  ;;  %v68_v5 = vrot.slane %v14_v0, 1  ;;  %99 = vrot.lane.b32.xlu1 %v17_v1, %s1062_s18  ;;  %v50_v6 = vrot.slane %v17_v1, 7  ;;  %v16_v7 = vld [vmem:[%s1397_s0 + $0x10] sm:$0xff]  ;;  %v136_v8 = vld [vmem:[%s1398_s1] sm:$0xff]  ;;  %v71_v9 = vrot.slane %v17_v1, 1 }
   0x3   :  { %v69_v10 = vrot.slane %v15_v2, 1  ;;  %v1108_v11 = vshrl.u32 %v18_v3, 7  ;;  %v49_v12 = vrot.slane %v16_v7, 7  ;;  %v137_v13 = vld [vmem:[%s1398_s1 + $0x8] sm:$0x1f]  ;;  %v70_v14 = vrot.slane %v16_v7, 1 }
   0x4   :  { %v943_v15 = vpack.c.bf16 %v137_v13, %v136_v8 }
   0x5   :  { %9 = vsyncpa [#allocation3], 0  ;;  %v48_v16 = vrot.slane %v15_v2, 7  ;;  %vm72_vm1 = vcmp.lt.s32.totalorder %v1108_v11, 7  ;;  %v1115_v17 = vadd.s32 8, %v1108_v11  ;;  %v1118_v18 = vadd.s32 24, %v1108_v11 }
   0x6   :  { %vm1063_vm2 = vmmov 1   ;;  %95 = vrot.lane.b32.xlu0 %v15_v2, %s1062_s18  ;;  %v75_v19 = vsel %vm72_vm1, %v68_v5, %v69_v10  ;;  %v74_v20 = vsel %vm72_vm1, %v69_v10, %v70_v14  ;;  %s1064_s0 = smov 8   ;;  %vm51_vm5 = vcmp.lt.s32.totalorder %v1108_v11, 1  ;;  %v338_v0 = vld [vmem:[%s1398_s1 + $0x10] sm:$0xff]  ;;  %v339_v1 = vld [vmem:[%s1398_s1 + $0x18] sm:$0xff]  ;;  %v340_v8 = vld [vmem:[%s1398_s1 + $0x20] sm:$0xff] }
   0x7   :  { %vm944_vm3 = vmpackc.low %vm151_vm0, %vm1063_vm2  ;;  %109 = vrot.lane.b32.xlu1 %v75_v19, %s1064_s0  ;;  %vm28_vm4 = vcmp.eq.s32.totalorder %v1115_v17, 15  ;;  %v55_v22 = vsel %vm51_vm5, %v50_v6, %v47_v4  ;;  %v52_v23 = vsel %vm51_vm5, %v49_v12, %v50_v6  ;;  %vm42_vm6 = vcmp.eq.s32.totalorder %v1118_v18, 31  ;;  %s1065_s6 = smov 16   ;;  %s1066_s7 = smov 120  }
   0x8   :  { %945 = vmatprep.subr.msk.bf16.mxu1 %vm944_vm3, %v943_v15  ;;  %v86_v21 = vsel %vm28_vm4, 0.0, %v74_v20  ;;  %v76_v24 = vsel %vm72_vm1, %v71_v9, %v68_v5  ;;  %v54_v25 = vsel %vm51_vm5, %v47_v4, %v48_v16  ;;  %v53_v26 = vsel %vm51_vm5, %v48_v16, %v49_v12  ;;  %s1069_s19 = smov [#allocation2]  }
   0x9   :  { %948 = vmatpush3.bf16.msk.msra.mxu1 %vm944_vm3, %v943_v15  ;;  %v73_v27 = vsel %vm72_vm1, %v70_v14, %v71_v9  ;;  %v88_v28 = vsel %vm42_vm6, 0.0, %v76_v24  ;;  %vm23_vm7 = vcmp.eq.s32.totalorder %v1108_v11, 0  ;;  %vm121_vm8 = vcmask 31744   ;;  %v341_v9 = vld [vmem:[%s1398_s1 + $0x28] sm:$0x1]  ;;  %s818_s20 = sshll.u32 %s1069_s19, 4  ;;  %s819_s20 = int_to_ptr.vmem [resolvable:$true] %s818_s20 }
   0xa   :  { %97 = vrot.lane.b32.xlu0 %v16_v7, %s1062_s18  ;;  %v64_v31 = vsel %vm23_vm7, 0.0, %v55_v22  ;;  %v1154_v32 = vadd.s32 16, %v1108_v11  ;;  %vm126_vm9 = vcmask 64512   ;;  %vm131_vm10 = vcmask 97280   ;;  %s1038_s21 = scalar_lea.vmem %s819_s20, 256  ;;  %p1043_p1 = scmp.lt.s32.totalorder %s819_s20, %s819_s20 }
   0xb   :  { %111 = vrot.lane.b32.xlu1 %v86_v21, %s1064_s0  ;;  %vm138_vm11 = vcmask 105472   ;;  %vm355_vm13 = vcmask 1040384   ;;  %v949_v3 = vpack.c.bf16 %v339_v1, %v338_v0  ;;  %v953_v10 = vpack.c.bf16 %v341_v9, %v340_v8  ;;  %p1039_p0 = scmp.ne.s32.totalorder %s819_s20, %s1038_s21  ;;  %p1044_p2 = scmp.lt.s32.totalorder %s1038_s21, %s1038_s21 }
   0xc   :  { %vm33_vm12 = vcmp.eq.s32.totalorder %v1154_v32, 16  ;;  %vm1195_vm14 = vmpackc.low %vm355_vm13, %vm1063_vm2  ;;  %vm328_vm15 = vcmask 130048   ;;  %vm333_vm0 = vcmask 195584   ;;  %vm342_vm2 = vcmask 203776  }
   0xd   :  { %v66_v40 = vsel %vm33_vm12, 0.0, %v53_v26  ;;  %950 = vmatprep.subr.bf16.mxu0 %v949_v3  ;;  %vm505_vm3 = vcmp.eq.s32.totalorder %v1108_v11, 7  ;;  %p1045_p3 = por %p1044_p2, %p1043_p1 }
   0xe   :  { %113 = vrot.lane.b32.xlu0 %v73_v27, %s1064_s0  ;;  %952 = vmatpush3.bf16.msra.mxu0 %v949_v3 }
   0xf   :  { %115 = vrot.lane.b32.xlu1 %v88_v28, %s1064_s0  ;;  %955 = vmatprep.subr.msk.bf16.mxu0 %vm1195_vm14, %v953_v10  ;;  %p1046_p4 = pnand %p1045_p3, %p1039_p0 }
  0x12   :  { %958 = vmatpush3.bf16.msk.msra.mxu0 %vm1195_vm14, %v953_v10 }
  0x74   :  { %v94_v29 = vpop.permute.xlu0 %93  ;;  %v100_v30 = vpop.permute.xlu1 %99 }
  0x75   :  { %v122_v34 = vsel %vm121_vm8, %v64_v31, %v94_v29  ;;  %v125_v46 = vsel %vm121_vm8, %v52_v23, %v100_v30 }
  0x78   :  { %v96_v33 = vpop.permute.xlu0 %95 }
  0x79   :  { %v110_v35 = vpop.permute.xlu1 %109  ;;  %v123_v39 = vsel %vm121_vm8, %v54_v25, %v96_v33 }
  0x7a   :  { %v127_v36 = vsel %vm126_vm9, %v122_v34, %v110_v35 }
  0x7b   :  { %v132_v37 = vsel %vm131_vm10, %v127_v36, 1.0 }
  0x7c   :  { %v98_v38 = vpop.permute.xlu0 %97  ;;  %895 = vmatprep.mubr.msk.f32.mxu1 %vm138_vm11, %v132_v37 }
  0x7d   :  { %v112_v41 = vpop.permute.xlu1 %111  ;;  %v124_v44 = vsel %vm121_vm8, %v66_v40, %v98_v38 }
  0x7e   :  { %v128_v42 = vsel %vm126_vm9, %v123_v39, %v112_v41 }
  0x7f   :  { %v133_v43 = vsel %vm131_vm10, %v128_v42, 1.0 }
  0x80   :  { %v114_v45 = vpop.permute.xlu0 %113  ;;  %896 = vmatmul.mubr.msk.f32.vlgmr.msra.gmra.mrb[0].mxu1 %vm138_vm11, %v133_v43 }
  0x81   :  { %v129_v47 = vsel %vm126_vm9, %v124_v44, %v114_v45  ;;  %v116_v48 = vpop.permute.xlu1 %115 }
  0x82   :  { %v134_v49 = vsel %vm131_vm10, %v129_v47, 1.0  ;;  %v130_v50 = vsel %vm126_vm9, %v125_v46, %v116_v48 }
  0x83   :  { %v135_v51 = vsel %vm131_vm10, %v130_v50, 1.0  ;;  %898 = vmatprep.mubr.msk.f32.mxu1 %vm138_vm11, %v134_v49 }
  0x84   :  { %899 = vmatmul.mubr.msk.f32.gmra.mrb[2].mxu1 %vm138_vm11, %v135_v51 }
 0x153   :  { %v1175_v52 = vpop.f32.mrb[0].mxu1 }
 0x154   :  { %v837_v53 = vmul.f32 -1.442695, %v1175_v52  ;;  %v1178_v54 = vpop.f32.mrb[1].mxu1 }
 0x155   :  { %v836_v55 = vmul.f32 -1.442695, %v1178_v54 }
 0x156   :  { %990 = vpow2.f32 %v837_v53 }
 0x157   :  { %992 = vpow2.f32 %v836_v55  ;;  %v1181_v56 = vpop.f32.mrb[2].mxu1 }
 0x158   :  { %v839_v57 = vmul.f32 -1.442695, %v1181_v56  ;;  %v1184_v58 = vpop.f32.mrb[3].mxu1 }
 0x159   :  { %v838_v59 = vmul.f32 -1.442695, %v1184_v58 }
 0x15a   :  { %994 = vpow2.f32 %v839_v57 }
 0x15b   :  { %996 = vpow2.f32 %v838_v59 }
 0x160   :  { %v991_v60 = vpop.eup %990 }
 0x161   :  { %v993_v61 = vpop.eup %992  ;;  %v253_v62 = vadd.f32 1.0, %v991_v60 }
 0x162   :  { %v252_v63 = vadd.f32 1.0, %v993_v61 }
 0x163   :  { %998 = vrcp.f32 %v253_v62 }
 0x164   :  { %v995_v2 = vpop.eup %994  ;;  %1000 = vrcp.f32 %v252_v63 }
 0x165   :  { %v997_v4 = vpop.eup %996  ;;  %v255_v5 = vadd.f32 1.0, %v995_v2 }
 0x166   :  { %v254_v6 = vadd.f32 1.0, %v997_v4 }
 0x167   :  { %1002 = vrcp.f32 %v255_v5 }
 0x168   :  { %1004 = vrcp.f32 %v254_v6 }
 0x16d   :  { %v999_v12 = vpop.eup %998 }
 0x16e   :  { %v1001_v13 = vpop.eup %1000  ;;  %v265_v14 = vmul.f32 %v999_v12, %v1175_v52 }
 0x16f   :  { %v264_v15 = vmul.f32 %v1001_v13, %v1178_v54 }
 0x170   :  { %v269_v16 = vrot.slane %v265_v14, 7  ;;  %298 = vrot.lane.b32.xlu1 %v265_v14, %s1064_s0  ;;  %v281_v19 = vrot.slane %v265_v14, 1 }
 0x171   :  { %v1003_v20 = vpop.eup %1002  ;;  %v268_v21 = vrot.slane %v264_v15, 7  ;;  %296 = vrot.lane.b32.xlu0 %v264_v15, %s1064_s0  ;;  %v280_v22 = vrot.slane %v264_v15, 1 }
 0x172   :  { %v1005_v23 = vpop.eup %1004  ;;  %v267_v24 = vmul.f32 %v1003_v20, %v1181_v56 }
 0x173   :  { %v266_v25 = vmul.f32 %v1005_v23, %v1184_v58  ;;  %v286_v26 = vsel %vm72_vm1, %v280_v22, %v281_v19  ;;  %v274_v27 = vsel %vm51_vm5, %v268_v21, %v269_v16 }
 0x174   :  { %v271_v28 = vrot.slane %v267_v24, 7  ;;  %302 = vrot.lane.b32.xlu1 %v267_v24, %s1064_s0  ;;  %v283_v29 = vrot.slane %v267_v24, 1  ;;  %v555_v24 = vld [vmem:[%s1398_s1 + $0x30] sm:$0xff] }
 0x175   :  { %v270_v30 = vrot.slane %v266_v25, 7  ;;  %312 = vrot.lane.b32.xlu0 %v286_v26, %s1065_s6  ;;  %v282_v31 = vrot.slane %v266_v25, 1 }
 0x176   :  { %v287_v33 = vsel %vm72_vm1, %v283_v29, %v280_v22  ;;  %v275_v34 = vsel %vm51_vm5, %v271_v28, %v268_v21 }
 0x177   :  { %v285_v35 = vsel %vm72_vm1, %v281_v19, %v282_v31  ;;  %v284_v36 = vsel %vm72_vm1, %v282_v31, %v283_v29  ;;  %v272_v38 = vsel %vm51_vm5, %v270_v30, %v271_v28  ;;  %v273_v39 = vsel %vm51_vm5, %v269_v16, %v270_v30 }
 0x178   :  { %v289_v37 = vsel %vm28_vm4, 0.0, %v285_v35  ;;  %v291_v40 = vsel %vm42_vm6, 0.0, %v287_v33  ;;  %v276_v18 = vsel %vm23_vm7, 0.0, %v275_v34  ;;  %v278_v53 = vsel %vm33_vm12, 0.0, %v273_v39 }
 0x179   :  { %300 = vrot.lane.b32.xlu0 %v266_v25, %s1064_s0  ;;  %314 = vrot.lane.b32.xlu1 %v289_v37, %s1065_s6  ;;  %v556_v25 = vld [vmem:[%s1398_s1 + $0x38] sm:$0xff]  ;;  %v558_v37 = vld [vmem:[%s1398_s1 + $0x48] sm:$0x1]  ;;  %vm508_vm6 = vcmp.eq.s32.totalorder %v1115_v17, 8 }
 0x17d   :  { %318 = vrot.lane.b32.xlu1 %v291_v40, %s1065_s6  ;;  %316 = vrot.lane.b32.xlu0 %v284_v36, %s1065_s6  ;;  %v557_v36 = vld [vmem:[%s1398_s1 + $0x40] sm:$0xff] }
 0x17e   :  { %v963_v39 = vpack.c.bf16 %v558_v37, %v557_v36 }
 0x181   :  { %478 = vrot.lane.b32.xlu1 %v1175_v52, %s1066_s7  ;;  %476 = vrot.lane.b32.xlu0 %v1178_v54, %s1066_s7 }
 0x185   :  { %482 = vrot.lane.b32.xlu1 %v1181_v56, %s1066_s7  ;;  %480 = vrot.lane.b32.xlu0 %v1184_v58, %s1066_s7 }
 0x1e2   :  { %v299_v41 = vpop.permute.xlu1 %298 }
 0x1e3   :  { %v297_v42 = vpop.permute.xlu0 %296  ;;  %v325_v48 = vsel %vm126_vm9, %v274_v27, %v299_v41  ;;  %v959_v27 = vpack.c.bf16 %v556_v25, %v555_v24 }
 0x1e4   :  { %v324_v44 = vsel %vm126_vm9, %v276_v18, %v297_v42 }
 0x1e5   :  { %960 = vmatprep.subr.bf16.mxu0 %v959_v27 }
 0x1e6   :  { %v303_v43 = vpop.permute.xlu1 %302 }
 0x1e7   :  { %v313_v45 = vpop.permute.xlu0 %312  ;;  %v327_v54 = vsel %vm126_vm9, %v272_v38, %v303_v43 }
 0x1e8   :  { %v329_v46 = vsel %vm328_vm15, %v324_v44, %v313_v45 }
 0x1e9   :  { %v334_v47 = vsel %vm333_vm0, %v329_v46, 1.0 }
 0x1ea   :  { %909 = vmatprep.mubr.msk.f32.mxu0 %vm342_vm2, %v334_v47 }
 0x1eb   :  { %v301_v49 = vpop.permute.xlu0 %300  ;;  %v315_v50 = vpop.permute.xlu1 %314 }
 0x1ec   :  { %v330_v51 = vsel %vm328_vm15, %v325_v48, %v315_v50  ;;  %v326_v55 = vsel %vm126_vm9, %v278_v53, %v301_v49 }
 0x1ed   :  { %v335_v52 = vsel %vm333_vm0, %v330_v51, 1.0 }
 0x1ee   :  { %910 = vmatmul.mubr.msk.f32.vlgmr.msra.gmra.mrb[0].mxu0 %vm342_vm2, %v335_v52 }
 0x1ef   :  { %v319_v56 = vpop.permute.xlu1 %318  ;;  %v317_v57 = vpop.permute.xlu0 %316  ;;  %962 = vmatpush3.bf16.msra.mxu0 %v959_v27 }
 0x1f0   :  { %v332_v58 = vsel %vm328_vm15, %v327_v54, %v319_v56  ;;  %v331_v59 = vsel %vm328_vm15, %v326_v55, %v317_v57  ;;  %965 = vmatprep.subr.msk.bf16.mxu0 %vm1195_vm14, %v963_v39 }
 0x1f1   :  { %v337_v60 = vsel %vm333_vm0, %v332_v58, 1.0  ;;  %v336_v61 = vsel %vm333_vm0, %v331_v59, 1.0 }
 0x1f2   :  { %912 = vmatprep.mubr.msk.f32.mxu0 %vm342_vm2, %v336_v61 }
 0x1f3   :  { %913 = vmatmul.mubr.msk.f32.gmra.mrb[2].mxu0 %vm342_vm2, %v337_v60  ;;  %v479_v19 = vpop.permute.xlu1 %478  ;;  %v477_v21 = vpop.permute.xlu0 %476 }
 0x1f4   :  { %968 = vmatpush3.bf16.msk.msra.mxu0 %vm1195_vm14, %v963_v39 }
 0x1f7   :  { %v483_v31 = vpop.permute.xlu1 %482  ;;  %v481_v34 = vpop.permute.xlu0 %480 }
 0x2c1   :  { %v911_v32 = vpop.f32.mrb[0].mxu0 }
 0x2c2   :  { %v846_v62 = vmul.f32 -1.442695, %v911_v32  ;;  %v425_v63 = vpop.f32.mrb[1].mxu0 }
 0x2c3   :  { %v845_v0 = vmul.f32 -1.442695, %v425_v63 }
 0x2c4   :  { %1006 = vpow2.f32 %v846_v62 }
 0x2c5   :  { %1008 = vpow2.f32 %v845_v0 }
 0x2c6   :  { %v914_v1 = vpop.f32.mrb[2].mxu0 }
 0x2c7   :  { %v848_v2 = vmul.f32 -1.442695, %v914_v1  ;;  %v435_v3 = vpop.f32.mrb[3].mxu0 }
 0x2c8   :  { %v847_v4 = vmul.f32 -1.442695, %v435_v3 }
 0x2c9   :  { %1010 = vpow2.f32 %v848_v2  ;;  %v694_v2 = vld [vmem:[%s1398_s1 + $0x58] sm:$0xff] }
 0x2ca   :  { %1012 = vpow2.f32 %v847_v4 }
 0x2ce   :  { %v1007_v5 = vpop.eup %1006 }
 0x2cf   :  { %v1009_v6 = vpop.eup %1008  ;;  %v457_v8 = vadd.f32 1.0, %v1007_v5  ;;  %v696_v5 = vld [vmem:[%s1398_s1 + $0x68] sm:$0xff] }
 0x2d0   :  { %v456_v9 = vadd.f32 1.0, %v1009_v6 }
 0x2d1   :  { %1014 = vrcp.f32 %v457_v8 }
 0x2d2   :  { %1016 = vrcp.f32 %v456_v9 }
 0x2d3   :  { %v1011_v10 = vpop.eup %1010 }
 0x2d4   :  { %v1013_v12 = vpop.eup %1012  ;;  %v459_v13 = vadd.f32 1.0, %v1011_v10 }
 0x2d5   :  { %v458_v14 = vadd.f32 1.0, %v1013_v12 }
 0x2d6   :  { %1018 = vrcp.f32 %v459_v13 }
 0x2d7   :  { %1020 = vrcp.f32 %v458_v14 }
 0x2db   :  { %v1015_v15 = vpop.eup %1014 }
 0x2dc   :  { %v1017_v16 = vpop.eup %1016  ;;  %v469_v20 = vmul.f32 %v1015_v15, %v911_v32 }
 0x2dd   :  { %v468_v22 = vmul.f32 %v1017_v16, %v425_v63 }
 0x2de   :  { %v489_v23 = vadd.f32 %v479_v19, %v469_v20  ;;  %v697_v19 = vld [vmem:[%s1398_s1 + $0x70] sm:$0xff]  ;;  %v698_v20 = vld [vmem:[%s1398_s1 + $0x78] sm:$0xff] }
 0x2df   :  { %v488_v26 = vadd.f32 %v477_v21, %v468_v22  ;;  %v977_v21 = vpack.c.bf16 %v698_v20, %v697_v19  ;;  %v699_v22 = vld [vmem:[%s1398_s1 + $0x80] sm:$0x1] }
 0x2e0   :  { %v1019_v28 = vpop.eup %1018  ;;  %493 = vst.msk [vmem:[%s1399_s2 + $0x8] sm:$0xff] %vm126_vm9, %v489_v23 }
 0x2e1   :  { %v1021_v29 = vpop.eup %1020  ;;  %492 = vst.msk [vmem:[%s1399_s2] sm:$0xff] %vm126_vm9, %v488_v26  ;;  %v471_v30 = vmul.f32 %v1019_v28, %v914_v1  ;;  %v693_v1 = vld [vmem:[%s1398_s1 + $0x50] sm:$0xff] }
 0x2e2   :  { %v470_v33 = vmul.f32 %v1021_v29, %v435_v3  ;;  %v695_v3 = vld [vmem:[%s1398_s1 + $0x60] sm:$0xff]  ;;  %v969_v4 = vpack.c.bf16 %v694_v2, %v693_v1  ;;  %s1067_s1 = smov 32  }
 0x2e3   :  { %v491_v35 = vadd.f32 %v483_v31, %v471_v30  ;;  %v973_v6 = vpack.c.bf16 %v696_v5, %v695_v3 }
 0x2e4   :  { %v490_v38 = vadd.f32 %v481_v34, %v470_v33  ;;  %970 = vmatprep.subr.bf16.mxu1 %v969_v4 }
 0x2e5   :  { %495 = vst.msk [vmem:[%s1399_s2 + $0x18] sm:$0xff] %vm126_vm9, %v491_v35  ;;  %972 = vmatpush3.bf16.msra.mxu1 %v969_v4 }
 0x2e6   :  { %494 = vst.msk [vmem:[%s1399_s2 + $0x10] sm:$0xff] %vm126_vm9, %v490_v38  ;;  %974 = vmatprep.subr.bf16.mxu1 %v973_v6 }
 0x2e8   :  { %v496_v40 = vld [vmem:[%s1399_s2] ss:$2 sm:$0xff]  ;;  %v850_v41 = vld [vmem:[%s1399_s2 + $0x1] ss:$2 sm:$0xff] }
 0x2e9   :  { %v503_v42 = vmax.f32 %v496_v40, %v850_v41  ;;  %976 = vmatpush3.bf16.msra.mxu1 %v973_v6 }
 0x2ea   :  { %978 = vmatprep.subr.bf16.mxu1 %v977_v21 }
 0x2eb   :  { %535 = vrot.lane.b32.xlu0 %v503_v42, %s1064_s0  ;;  %v513_v44 = vrot.slane %v503_v42, 7  ;;  %v523_v46 = vrot.slane %v503_v42, 1 }
 0x2ed   :  { %v849_v18 = vld [vmem:[%s1399_s2 + $0x10] ss:$2 sm:$0xff]  ;;  %v851_v7 = vld [vmem:[%s1399_s2 + $0x11] ss:$2 sm:$0xff]  ;;  %980 = vmatpush3.bf16.msra.mxu1 %v977_v21 }
 0x2ee   :  { %v504_v43 = vmax.f32 %v849_v18, %v851_v7  ;;  %938 = vmatprep.subr.msk.mxu1 %vm355_vm13, %v699_v22 }
 0x2f0   :  { %537 = vrot.lane.b32.xlu1 %v504_v43, %s1064_s0  ;;  %v514_v45 = vrot.slane %v504_v43, 7  ;;  %v524_v47 = vrot.slane %v504_v43, 1 }
 0x2f1   :  { %939 = vmatpush3.msk.msra.mxu1 %vm355_vm13, %v699_v22 }
 0x2f2   :  { %v526_v48 = vsel %vm72_vm1, %v524_v47, %v523_v46  ;;  %v525_v49 = vsel %vm72_vm1, %v523_v46, %v524_v47  ;;  %v516_v50 = vsel %vm51_vm5, %v514_v45, %v513_v44  ;;  %v515_v51 = vsel %vm51_vm5, %v513_v44, %v514_v45 }
 0x2f3   :  { %v532_v52 = vsel %vm28_vm4, 0.0, %v526_v48  ;;  %v531_v53 = vsel %vm505_vm3, 0.0, %v525_v49  ;;  %v521_v56 = vsel %vm23_vm7, 0.0, %v516_v50  ;;  %v522_v57 = vsel %vm508_vm6, 0.0, %v515_v51 }
 0x2f4   :  { %545 = vrot.lane.b32.xlu1 %v532_v52, %s1065_s6  ;;  %543 = vrot.lane.b32.xlu0 %v531_v53, %s1065_s6 }
 0x35d   :  { %v536_v54 = vpop.permute.xlu0 %535 }
 0x35e   :  { %v549_v58 = vsel %vm126_vm9, %v521_v56, %v536_v54 }
 0x362   :  { %v538_v55 = vpop.permute.xlu1 %537 }
 0x363   :  { %v550_v59 = vsel %vm126_vm9, %v522_v57, %v538_v55 }
 0x366   :  { %v546_v60 = vpop.permute.xlu1 %545  ;;  %v544_v61 = vpop.permute.xlu0 %543 }
 0x367   :  { %v552_v32 = vsel %vm328_vm15, %v550_v59, %v546_v60  ;;  %v551_v62 = vsel %vm328_vm15, %v549_v58, %v544_v61 }
 0x368   :  { %v554_v63 = vsel %vm333_vm0, %v552_v32, 1.0  ;;  %v553_v0 = vsel %vm333_vm0, %v551_v62, 1.0 }
 0x369   :  { %923 = vmatprep.mubr.msk.f32.mxu0 %vm342_vm2, %v553_v0 }
 0x36a   :  { %924 = vmatmul.mubr.msk.f32.vlgmr.msra.gmra.mrb[4].mxu0 %vm342_vm2, %v554_v63 }
 0x43d   :  { %v925_v8 = vpop.f32.mrb[4].mxu0 }
 0x43e   :  { %v856_v9 = vmul.f32 -1.442695, %v925_v8  ;;  %v634_v10 = vpop.f32.mrb[5].mxu0 }
 0x43f   :  { %v855_v12 = vmul.f32 -1.442695, %v634_v10 }
 0x440   :  { %1022 = vpow2.f32 %v856_v9 }
 0x441   :  { %1024 = vpow2.f32 %v855_v12 }
 0x44a   :  { %v1023_v13 = vpop.eup %1022 }
 0x44b   :  { %v1025_v14 = vpop.eup %1024  ;;  %v650_v15 = vadd.f32 1.0, %v1023_v13 }
 0x44c   :  { %v649_v16 = vadd.f32 1.0, %v1025_v14 }
 0x44d   :  { %1026 = vrcp.f32 %v650_v15 }
 0x44e   :  { %1028 = vrcp.f32 %v649_v16 }
 0x457   :  { %v1027_v23 = vpop.eup %1026 }
 0x458   :  { %v1029_v24 = vpop.eup %1028  ;;  %v656_v25 = vmul.f32 %v1027_v23, %v925_v8 }
 0x459   :  { %v655_v26 = vmul.f32 %v1029_v24, %v634_v10 }
 0x45a   :  { %v658_v27 = vrot.slane %v656_v25, 7  ;;  %673 = vrot.lane.b32.xlu1 %v656_v25, %s1065_s6  ;;  %v664_v28 = vrot.slane %v656_v25, 1 }
 0x45b   :  { %v657_v29 = vrot.slane %v655_v26, 7  ;;  %v663_v30 = vrot.slane %v655_v26, 1  ;;  %671 = vrot.lane.b32.xlu0 %v655_v26, %s1065_s6  ;;  %s1068_s6 = smov 112  }
 0x45d   :  { %v666_v31 = vsel %vm72_vm1, %v664_v28, %v663_v30  ;;  %v665_v33 = vsel %vm72_vm1, %v663_v30, %v664_v28  ;;  %v659_v34 = vsel %vm51_vm5, %v657_v29, %v658_v27  ;;  %v660_v35 = vsel %vm51_vm5, %v658_v27, %v657_v29 }
 0x45e   :  { %v668_v36 = vsel %vm28_vm4, 0.0, %v666_v31  ;;  %v667_v37 = vsel %vm505_vm3, 0.0, %v665_v33  ;;  %vm687_vm1 = vcmask 261120   ;;  %v662_v40 = vsel %vm508_vm6, 0.0, %v659_v34 }
 0x45f   :  { %681 = vrot.lane.b32.xlu1 %v668_v36, %s1067_s1  ;;  %679 = vrot.lane.b32.xlu0 %v667_v37, %s1067_s1  ;;  %v661_v41 = vsel %vm23_vm7, 0.0, %v660_v35  ;;  %vm690_vm5 = vcmask 392192   ;;  %vm700_vm4 = vcmask 400384  }
 0x463   :  { %803 = vrot.lane.b32.xlu1 %v925_v8, %s1068_s6  ;;  %801 = vrot.lane.b32.xlu0 %v634_v10, %s1068_s6 }
 0x4cc   :  { %v674_v38 = vpop.permute.xlu1 %673 }
 0x4cd   :  { %v672_v39 = vpop.permute.xlu0 %671  ;;  %v686_v42 = vsel %vm328_vm15, %v662_v40, %v674_v38 }
 0x4ce   :  { %v685_v18 = vsel %vm328_vm15, %v661_v41, %v672_v39 }
 0x4d1   :  { %v682_v7 = vpop.permute.xlu1 %681  ;;  %v680_v43 = vpop.permute.xlu0 %679 }
 0x4d2   :  { %v689_v44 = vsel %vm687_vm1, %v686_v42, %v682_v7  ;;  %v688_v45 = vsel %vm687_vm1, %v685_v18, %v680_v43 }
 0x4d3   :  { %v692_v46 = vsel %vm690_vm5, %v689_v44, 1.0  ;;  %v691_v47 = vsel %vm690_vm5, %v688_v45, 1.0 }
 0x4d4   :  { %940 = vmatprep.mubr.msk.f32.mxu1 %vm700_vm4, %v691_v47 }
 0x4d5   :  { %941 = vmatmul.mubr.msk.f32.vlgmr.msra.gmra.mrb[4].mxu1 %vm700_vm4, %v692_v46  ;;  %v804_v57 = vpop.permute.xlu1 %803  ;;  %v802_v59 = vpop.permute.xlu0 %801 }
 0x5a8   :  { %v942_v48 = vpop.f32.mrb[4].mxu1 }
 0x5a9   :  { %v861_v17 = vmul.f32 -1.442695, %v942_v48  ;;  %v776_v49 = vpop.f32.mrb[5].mxu1 }
 0x5aa   :  { %v860_v50 = vmul.f32 -1.442695, %v776_v49 }
 0x5ab   :  { %1030 = vpow2.f32 %v861_v17 }
 0x5ac   :  { %1032 = vpow2.f32 %v860_v50 }
 0x5b5   :  { %v1031_v11 = vpop.eup %1030 }
 0x5b6   :  { %v1033_v51 = vpop.eup %1032  ;;  %v792_v52 = vadd.f32 1.0, %v1031_v11 }
 0x5b7   :  { %v791_v53 = vadd.f32 1.0, %v1033_v51 }
 0x5b8   :  { %1034 = vrcp.f32 %v792_v52 }
 0x5b9   :  { %1036 = vrcp.f32 %v791_v53 }
 0x5c2   :  { %v1035_v54 = vpop.eup %1034 }
 0x5c3   :  { %v1037_v55 = vpop.eup %1036  ;;  %v798_v56 = vmul.f32 %v1035_v54, %v942_v48 }
 0x5c4   :  { %v797_v58 = vmul.f32 %v1037_v55, %v776_v49 }
 0x5c5   :  { %v808_v60 = vadd.f32 %v804_v57, %v798_v56 }
 0x5c6   :  { %v807_v61 = vadd.f32 %v802_v59, %v797_v58 }
 0x5c7   :  { %810 = vst.msk [vmem:[#allocation2 + $0x8] sm:$0xff] %vm328_vm15, %v808_v60 }
 0x5c8   :  { %809 = vst.msk [vmem:[#allocation2] sm:$0xff] %vm328_vm15, %v807_v61 }
 0x5c9   :  { %1049 = shalt.err (!%p1046_p4)
}
 0x5ca   :  { %s1050_s24 = scalar_lea.hbm %s1400_s3, 256 }
 0x5cb   :  { %p1051_p5 = scmp.ne.s32.totalorder %s1400_s3, %s1050_s24  ;;  %p1054_p6 = scmp.lt.u32.totalorder %s1050_s24, %s1400_s3 }
 0x5cd   :  { %p1056_p7 = pnand %p1054_p6, %p1051_p5 }
 0x5cf   :  { %1059 = shalt.err (!%p1056_p7)
}
 0x5d0   :  { %s1070_s29 = smov 128  }
 0x5d1   :  { %824 = dma.vmem_to_hbm [thread:$0]  %s819_s20, 256, %s1400_s3, [#allocation3], %s1070_s29, %s1070_s29, %s1064_s0  }
 0x5d2   :  { %1060 = dma.done.wait [#allocation3], 256  }
 0x5d3   :  { %1061 = vsyncadd [#allocation3], 4294967040 }
 0x5d4   :  { %830 = vsyncpa [#allocation3], 1 }

// kernel: tpu_custom_call.1
= control target key start
LH: loop header
LB: loop body
LE: loop exit
PB: predicated region body
PF: predicated region fallthrough
CT: control target
= control target key end

     0   :  { %vm104_vm0 = vcmask 1043456   ;;  %vm91_vm1 = vcmask 31744   ;;  %v18_v3 = vlaneseq  ;;  %s2025_s0 = inlined_call_operand.vmem [shape: f32[32,4], index: 0, kind: input, shape index: {}]   ;;  %s2026_s1 = inlined_call_operand.vmem [shape: f32[136,32], index: 1, kind: input, shape index: {}]   ;;  %s2027_s2 = inlined_call_operand.vmem [shape: f32[32,8], index: 2, kind: output, shape index: {0}]   ;;  %s2028_s3 = inlined_call_operand.hbm [shape: f32[16,16], index: 3, kind: output, shape index: {1}]  }
   0x1   :  { %v90_v0 = vld [vmem:[%s2026_s1 + $0x4] sm:$0xf]  ;;  %v15_v2 = vld [vmem:[%s2025_s0 + $0x8] sm:$0xff]  ;;  %v89_v5 = vld [vmem:[%s2026_s1] sm:$0xf] }
   0x2   :  { %v14_v1 = vld [vmem:[%s2025_s0] sm:$0xff]  ;;  %1551 = vmatprep.subr.msk.mxu0 %vm104_vm0, %v90_v0  ;;  %v16_v6 = vld [vmem:[%s2025_s0 + $0x10] sm:$0xff]  ;;  %v17_v7 = vld [vmem:[%s2025_s0 + $0x18] sm:$0xff]  ;;  %v1794_v8 = vshrl.u32 %v18_v3, 7 }
   0x3   :  { %v47_v4 = vrot.slane %v14_v1, 7  ;;  %1553 = vmatprep.mubr.msk.f32.mxu0 %vm91_vm1, %v14_v1  ;;  %1552 = vmatpush3.msk.msra.mxu0 %vm104_vm0, %v90_v0  ;;  %v293_v9 = vld [vmem:[%s2026_s1 + $0x8] sm:$0xf]  ;;  %v49_v10 = vrot.slane %v16_v6, 7  ;;  %v50_v11 = vrot.slane %v17_v7, 7 }
   0x4   :  { %1554 = vmatmul.mubr.msk.f32.vlgmr.msra.gmra.mrb[0].mxu0 %vm91_vm1, %v15_v2  ;;  %1559 = vmatprep.subr.msk.mxu0 %vm104_vm0, %v89_v5 }
   0x5   :  { %9 = vsyncpa [#allocation3], 0  ;;  %v48_v12 = vrot.slane %v15_v2, 7  ;;  %1560 = vmatpush3.msk.msra.mxu0 %vm104_vm0, %v89_v5  ;;  %1556 = vmatprep.mubr.msk.f32.mxu0 %vm91_vm1, %v16_v6  ;;  %vm23_vm2 = vcmp.eq.s32.totalorder %v1794_v8, 0  ;;  %vm51_vm3 = vcmp.lt.s32.totalorder %v1794_v8, 1  ;;  %v1806_v13 = vadd.s32 16, %v1794_v8 }
   0x6   :  { %v55_v14 = vsel %vm51_vm3, %v50_v11, %v47_v4  ;;  %1567 = vmatprep.subr.msk.mxu0 %vm104_vm0, %v293_v9  ;;  %v68_v17 = vrot.slane %v14_v1, 1  ;;  %v69_v19 = vrot.slane %v15_v2, 1  ;;  %v70_v20 = vrot.slane %v16_v6, 1  ;;  %v460_v32 = vld [vmem:[%s2026_s1 + $0x18] sm:$0xff]  ;;  %v459_v33 = vld [vmem:[%s2026_s1 + $0x10] sm:$0xff]  ;;  %s1748_s4 = smov 120  }
   0x7   :  { %v64_v15 = vsel %vm23_vm2, 0.0, %v55_v14  ;;  %vm33_vm4 = vcmp.eq.s32.totalorder %v1806_v13, 16  ;;  %v53_v16 = vsel %vm51_vm3, %v48_v12, %v49_v10  ;;  %v54_v18 = vsel %vm51_vm3, %v47_v4, %v48_v12  ;;  %1575 = vmatprep.subr.mxu1 %v460_v32  ;;  %v1457_v34 = vld [vmem:[%s2026_s1 + $0xc] ss:$0 sm:$0xff]  ;;  %v656_v63 = vld [vmem:[%s2026_s1 + $0x20] sm:$0xff]  ;;  %v857_v13 = vld [vmem:[%s2026_s1 + $0x38] sm:$0xff] }
   0x8   :  { %1557 = vmatmul.mubr.msk.f32.gmra.mrb[2].mxu0 %vm91_vm1, %v17_v7  ;;  %v66_v21 = vsel %vm33_vm4, 0.0, %v53_v16  ;;  %v1823_v22 = vadd.s32 8, %v1794_v8  ;;  %vm72_vm5 = vcmp.lt.s32.totalorder %v1794_v8, 7  ;;  %v71_v23 = vrot.slane %v17_v7, 1  ;;  %1576 = vmatpush3.msra.mxu1 %v460_v32  ;;  %s1749_s12 = smov 112   ;;  %s1750_s19 = smov [#allocation2]  }
   0x9   :  { %1561 = vmatprep.mubr.msk.f32.mxu0 %vm91_vm1, %v64_v15  ;;  %v52_v24 = vsel %vm51_vm3, %v49_v10, %v50_v11  ;;  %v75_v25 = vsel %vm72_vm5, %v68_v17, %v69_v19  ;;  %v74_v26 = vsel %vm72_vm5, %v69_v19, %v70_v20  ;;  %v1837_v27 = vadd.s32 24, %v1794_v8  ;;  %1583 = vmatprep.subr.mxu1 %v459_v33  ;;  %s1429_s20 = sshll.u32 %s1750_s19, 4  ;;  %s1430_s20 = int_to_ptr.vmem [resolvable:$true] %s1429_s20 }
   0xa   :  { %vm28_vm6 = vcmp.eq.s32.totalorder %v1823_v22, 15  ;;  %v73_v29 = vsel %vm72_vm5, %v70_v20, %v71_v23  ;;  %v76_v30 = vsel %vm72_vm5, %v71_v23, %v68_v17  ;;  %vm461_vm8 = vcmask 64512   ;;  %v856_v23 = vld [vmem:[%s2026_s1 + $0x30] sm:$0xff]  ;;  %p1729_p1 = scmp.lt.s32.totalorder %s1430_s20, %s1430_s20 }
   0xb   :  { %v86_v28 = vsel %vm28_vm6, 0.0, %v74_v26  ;;  %vm42_vm7 = vcmp.eq.s32.totalorder %v1837_v27, 31  ;;  %vm831_vm9 = vcmp.eq.s32.totalorder %v1823_v22, 8  ;;  %vm828_vm10 = vcmp.eq.s32.totalorder %v1794_v8, 7 }
   0xc   :  { %1562 = vmatmul.mubr.msk.f32.vlgmr.msra.gmra.mrb[0].mxu0 %vm91_vm1, %v54_v18  ;;  %v88_v31 = vsel %vm42_vm7, 0.0, %v76_v30  ;;  %vm1141_vm11 = vcmask 130048  }
   0xd   :  { %1568 = vmatpush3.msk.msra.mxu0 %vm104_vm0, %v293_v9  ;;  %1564 = vmatprep.mubr.msk.f32.mxu0 %vm91_vm1, %v66_v21 }
   0xe   :  { %1599 = vmatprep.subr.mxu0 %v857_v13 }
  0x10   :  { %1565 = vmatmul.mubr.msk.f32.gmra.mrb[2].mxu0 %vm91_vm1, %v52_v24  ;;  %v1474_v24 = vld [vmem:[%s2026_s1 + $0x28] ss:$0 sm:$0xff] }
  0x11   :  { %1569 = vmatprep.mubr.msk.f32.mxu0 %vm91_vm1, %v75_v25 }
  0x14   :  { %1570 = vmatmul.mubr.msk.f32.vlgmr.msra.gmra.mrb[0].mxu0 %vm91_vm1, %v86_v28 }
  0x15   :  { %1572 = vmatprep.mubr.msk.f32.mxu0 %vm91_vm1, %v73_v29  ;;  %1600 = vmatpush3.msra.mxu0 %v857_v13  ;;  %v1138_v13 = vld [vmem:[%s2026_s1 + $0x58] sm:$0xff] }
  0x16   :  { %1604 = vmatprep.subr.mxu0 %v856_v23 }
  0x18   :  { %1573 = vmatmul.mubr.msk.f32.gmra.mrb[2].mxu0 %vm91_vm1, %v88_v31 }
  0xe7   :  { %v1571_v35 = vpop.f32.mrb[0].mxu0 }
  0xe8   :  { %v404_v36 = vadd.f32 %v1571_v35, %v1457_v34  ;;  %v375_v37 = vpop.f32.mrb[1].mxu0 }
  0xe9   :  { %v403_v38 = vadd.f32 %v1457_v34, %v375_v37 }
  0xea   :  { %v1459_v39 = vmul.f32 -1.442695, %v404_v36 }
  0xeb   :  { %v1458_v40 = vmul.f32 -1.442695, %v403_v38  ;;  %799 = vrot.lane.b32.xlu0 %v403_v38, %s1748_s4  ;;  %v1574_v41 = vpop.f32.mrb[2].mxu0 }
  0xec   :  { %1676 = vpow2.f32 %v1459_v39  ;;  %v406_v42 = vadd.f32 %v1574_v41, %v1457_v34  ;;  %v385_v43 = vpop.f32.mrb[3].mxu0 }
  0xed   :  { %1678 = vpow2.f32 %v1458_v40  ;;  %v405_v44 = vadd.f32 %v1457_v34, %v385_v43 }
  0xee   :  { %v1461_v45 = vmul.f32 -1.442695, %v406_v42 }
  0xef   :  { %v1460_v46 = vmul.f32 -1.442695, %v405_v44  ;;  %801 = vrot.lane.b32.xlu0 %v404_v36, %s1748_s4  ;;  %803 = vrot.lane.b32.xlu1 %v405_v44, %s1748_s4 }
  0xf0   :  { %1680 = vpow2.f32 %v1461_v45 }
  0xf1   :  { %1682 = vpow2.f32 %v1460_v46 }
  0xf3   :  { %805 = vrot.lane.b32.xlu1 %v406_v42, %s1748_s4 }
  0xf6   :  { %v1677_v47 = vpop.eup %1676 }
  0xf7   :  { %v1679_v48 = vpop.eup %1678  ;;  %v420_v49 = vadd.f32 1.0, %v1677_v47 }
  0xf8   :  { %v419_v50 = vadd.f32 1.0, %v1679_v48 }
  0xf9   :  { %1684 = vrcp.f32 %v420_v49 }
  0xfa   :  { %v1681_v51 = vpop.eup %1680  ;;  %1686 = vrcp.f32 %v419_v50 }
  0xfb   :  { %v1683_v52 = vpop.eup %1682  ;;  %v422_v53 = vadd.f32 1.0, %v1681_v51 }
  0xfc   :  { %v421_v54 = vadd.f32 1.0, %v1683_v52 }
  0xfd   :  { %1688 = vrcp.f32 %v422_v53 }
  0xfe   :  { %1690 = vrcp.f32 %v421_v54 }
 0x103   :  { %v1685_v55 = vpop.eup %1684 }
 0x104   :  { %v1687_v56 = vpop.eup %1686  ;;  %v432_v57 = vmul.f32 %v1685_v55, %v404_v36 }
 0x105   :  { %v431_v58 = vmul.f32 %v1687_v56, %v403_v38 }
 0x106   :  { %v436_v59 = vrot.slane %v432_v57, 7  ;;  %v448_v60 = vrot.slane %v432_v57, 1 }
 0x107   :  { %v1689_v61 = vpop.eup %1688  ;;  %v435_v62 = vrot.slane %v431_v58, 7  ;;  %1577 = vmatprep.mubr.msk.f32.mxu1 %vm461_vm8, %v431_v58  ;;  %v447_v0 = vrot.slane %v431_v58, 1 }
 0x108   :  { %v1691_v1 = vpop.eup %1690  ;;  %v434_v2 = vmul.f32 %v1689_v61, %v406_v42  ;;  %1578 = vmatmul.mubr.msk.f32.vlgmr.msra.gmra.mrb[0].mxu1 %vm461_vm8, %v432_v57 }
 0x109   :  { %v433_v3 = vmul.f32 %v1691_v1, %v405_v44  ;;  %1584 = vmatpush3.msra.mxu1 %v459_v33  ;;  %v441_v4 = vsel %vm51_vm3, %v435_v62, %v436_v59  ;;  %v453_v5 = vsel %vm72_vm5, %v447_v0, %v448_v60 }
 0x10a   :  { %v438_v6 = vrot.slane %v434_v2, 7  ;;  %1591 = vmatprep.subr.mxu1 %v656_v63  ;;  %v450_v7 = vrot.slane %v434_v2, 1 }
 0x10b   :  { %v449_v9 = vrot.slane %v433_v3, 1  ;;  %1580 = vmatprep.mubr.msk.f32.mxu1 %vm461_vm8, %v433_v3  ;;  %v437_v10 = vrot.slane %v433_v3, 7  ;;  %v1020_v3 = vld [vmem:[%s2026_s1 + $0x40] sm:$0xff] }
 0x10c   :  { %1581 = vmatmul.mubr.msk.f32.gmra.mrb[2].mxu1 %vm461_vm8, %v434_v2  ;;  %v442_v11 = vsel %vm51_vm3, %v438_v6, %v435_v62  ;;  %v454_v12 = vsel %vm72_vm5, %v450_v7, %v447_v0 }
 0x10d   :  { %v443_v14 = vsel %vm23_vm2, 0.0, %v442_v11  ;;  %v440_v15 = vsel %vm51_vm3, %v436_v59, %v437_v10  ;;  %v439_v16 = vsel %vm51_vm3, %v437_v10, %v438_v6  ;;  %v452_v17 = vsel %vm72_vm5, %v448_v60, %v449_v9 }
 0x10e   :  { %1585 = vmatprep.mubr.msk.f32.mxu1 %vm461_vm8, %v443_v14  ;;  %v451_v18 = vsel %vm72_vm5, %v449_v9, %v450_v7  ;;  %v445_v19 = vsel %vm33_vm4, 0.0, %v440_v15  ;;  %v456_v20 = vsel %vm28_vm6, 0.0, %v452_v17  ;;  %v458_v21 = vsel %vm42_vm7, 0.0, %v454_v12 }
 0x110   :  { %1586 = vmatmul.mubr.msk.f32.vlgmr.msra.gmra.mrb[0].mxu1 %vm461_vm8, %v441_v4 }
 0x111   :  { %1588 = vmatprep.mubr.msk.f32.mxu1 %vm461_vm8, %v445_v19  ;;  %1592 = vmatpush3.msra.mxu1 %v656_v63  ;;  %v1140_v19 = vld [vmem:[%s2026_s1 + $0x68] sm:$0xff] }
 0x114   :  { %1589 = vmatmul.mubr.msk.f32.gmra.mrb[2].mxu1 %vm461_vm8, %v439_v16 }
 0x115   :  { %1593 = vmatprep.mubr.msk.f32.mxu1 %vm461_vm8, %v453_v5 }
 0x118   :  { %1594 = vmatmul.mubr.msk.f32.vlgmr.msra.gmra.mrb[0].mxu1 %vm461_vm8, %v456_v20 }
 0x119   :  { %1596 = vmatprep.mubr.msk.f32.mxu1 %vm461_vm8, %v451_v18  ;;  %v1139_v18 = vld [vmem:[%s2026_s1 + $0x60] sm:$0xff] }
 0x11a   :  { %v1635_v20 = vpack.c.bf16 %v1140_v19, %v1139_v18 }
 0x11c   :  { %1597 = vmatmul.mubr.msk.f32.gmra.mrb[2].mxu1 %vm461_vm8, %v458_v21  ;;  %1636 = vmatprep.subr.bf16.mxu1 %v1635_v20  ;;  %v1137_v21 = vld [vmem:[%s2026_s1 + $0x50] sm:$0xff] }
 0x11d   :  { %1638 = vmatpush3.bf16.msra.mxu1 %v1635_v20 }
 0x15d   :  { %v800_v45 = vpop.permute.xlu0 %799 }
 0x161   :  { %v804_v47 = vpop.permute.xlu1 %803  ;;  %v802_v50 = vpop.permute.xlu0 %801 }
 0x165   :  { %v806_v57 = vpop.permute.xlu1 %805 }
 0x1eb   :  { %v1595_v25 = vpop.f32.mrb[0].mxu1 }
 0x1ec   :  { %v764_v26 = vadd.f32 %v1595_v25, %v1474_v24  ;;  %v735_v27 = vpop.f32.mrb[1].mxu1 }
 0x1ed   :  { %v763_v28 = vadd.f32 %v1474_v24, %v735_v27 }
 0x1ee   :  { %v1476_v29 = vmul.f32 -1.442695, %v764_v26 }
 0x1ef   :  { %v1475_v30 = vmul.f32 -1.442695, %v763_v28  ;;  %v1598_v31 = vpop.f32.mrb[2].mxu1 }
 0x1f0   :  { %1692 = vpow2.f32 %v1476_v29  ;;  %v766_v32 = vadd.f32 %v1598_v31, %v1474_v24  ;;  %v745_v33 = vpop.f32.mrb[3].mxu1 }
 0x1f1   :  { %1694 = vpow2.f32 %v1475_v30  ;;  %v765_v34 = vadd.f32 %v1474_v24, %v745_v33  ;;  %v1488_v24 = vld [vmem:[%s2026_s1 + $0x48] ss:$0 sm:$0xff] }
 0x1f2   :  { %v1478_v35 = vmul.f32 -1.442695, %v766_v32 }
 0x1f3   :  { %v1477_v36 = vmul.f32 -1.442695, %v765_v34 }
 0x1f4   :  { %1696 = vpow2.f32 %v1478_v35 }
 0x1f5   :  { %1698 = vpow2.f32 %v1477_v36  ;;  %v1304_v36 = vld [vmem:[%s2026_s1 + $0x70] sm:$0xff] }
 0x1fa   :  { %v1693_v37 = vpop.eup %1692 }
 0x1fb   :  { %v1695_v38 = vpop.eup %1694  ;;  %v780_v39 = vadd.f32 1.0, %v1693_v37  ;;  %v1305_v37 = vld [vmem:[%s2026_s1 + $0x78] sm:$0xff] }
 0x1fc   :  { %v779_v40 = vadd.f32 1.0, %v1695_v38 }
 0x1fd   :  { %1700 = vrcp.f32 %v780_v39 }
 0x1fe   :  { %v1697_v41 = vpop.eup %1696  ;;  %1702 = vrcp.f32 %v779_v40 }
 0x1ff   :  { %v1699_v42 = vpop.eup %1698  ;;  %v782_v43 = vadd.f32 1.0, %v1697_v41 }
 0x200   :  { %v781_v44 = vadd.f32 1.0, %v1699_v42  ;;  %v1643_v42 = vpack.c.bf16 %v1305_v37, %v1304_v36 }
 0x201   :  { %1704 = vrcp.f32 %v782_v43 }
 0x202   :  { %1706 = vrcp.f32 %v781_v44 }
 0x207   :  { %v1701_v46 = vpop.eup %1700 }
 0x208   :  { %v1703_v48 = vpop.eup %1702  ;;  %v792_v49 = vmul.f32 %v1701_v46, %v764_v26 }
 0x209   :  { %v791_v51 = vmul.f32 %v1703_v48, %v763_v28 }
 0x20a   :  { %v812_v52 = vadd.f32 %v802_v50, %v792_v49 }
 0x20b   :  { %v1705_v53 = vpop.eup %1704  ;;  %v811_v54 = vadd.f32 %v800_v45, %v791_v51 }
 0x20c   :  { %v1707_v55 = vpop.eup %1706  ;;  %816 = vst.msk [vmem:[%s2027_s2 + $0x8] sm:$0xff] %vm461_vm8, %v812_v52  ;;  %v794_v56 = vmul.f32 %v1705_v53, %v766_v32 }
 0x20d   :  { %815 = vst.msk [vmem:[%s2027_s2] sm:$0xff] %vm461_vm8, %v811_v54  ;;  %v793_v58 = vmul.f32 %v1707_v55, %v765_v34  ;;  %v1497_v54 = vld [vmem:[%s2026_s1 + $0x80] ss:$0 sm:$0xff]  ;;  %s1724_s1 = scalar_lea.vmem %s1430_s20, 256 }
 0x20e   :  { %v814_v59 = vadd.f32 %v806_v57, %v794_v56  ;;  %p1725_p0 = scmp.ne.s32.totalorder %s1430_s20, %s1724_s1  ;;  %p1730_p2 = scmp.lt.s32.totalorder %s1724_s1, %s1724_s1 }
 0x20f   :  { %v813_v60 = vadd.f32 %v804_v47, %v793_v58 }
 0x210   :  { %818 = vst.msk [vmem:[%s2027_s2 + $0x18] sm:$0xff] %vm461_vm8, %v814_v59  ;;  %p1731_p3 = por %p1730_p2, %p1729_p1 }
 0x211   :  { %817 = vst.msk [vmem:[%s2027_s2 + $0x10] sm:$0xff] %vm461_vm8, %v813_v60 }
 0x212   :  { %p1732_p4 = pnand %p1731_p3, %p1725_p0 }
 0x214   :  { %v819_v61 = vld [vmem:[%s2027_s2] ss:$2 sm:$0xff]  ;;  %v1480_v62 = vld [vmem:[%s2027_s2 + $0x1] ss:$2 sm:$0xff] }
 0x215   :  { %v826_v63 = vmax.f32 %v819_v61, %v1480_v62 }
 0x217   :  { %1601 = vmatprep.mubr.msk.f32.mxu0 %vm461_vm8, %v826_v63  ;;  %v836_v4 = vrot.slane %v826_v63, 7  ;;  %v846_v10 = vrot.slane %v826_v63, 1 }
 0x218   :  { %v1479_v0 = vld [vmem:[%s2027_s2 + $0x10] ss:$2 sm:$0xff]  ;;  %v1481_v1 = vld [vmem:[%s2027_s2 + $0x11] ss:$2 sm:$0xff] }
 0x219   :  { %v827_v2 = vmax.f32 %v1479_v0, %v1481_v1 }
 0x21b   :  { %1602 = vmatmul.mubr.msk.f32.vlgmr.msra.gmra.mrb[4].mxu0 %vm461_vm8, %v827_v2  ;;  %v837_v5 = vrot.slane %v827_v2, 7  ;;  %v847_v6 = vrot.slane %v827_v2, 1 }
 0x21c   :  { %1605 = vmatpush3.msra.mxu0 %v856_v23  ;;  %v1639_v23 = vpack.c.bf16 %v1138_v13, %v1137_v21 }
 0x21d   :  { %v839_v7 = vsel %vm51_vm3, %v837_v5, %v836_v4  ;;  %1609 = vmatprep.subr.mxu0 %v1020_v3  ;;  %v838_v11 = vsel %vm51_vm3, %v836_v4, %v837_v5  ;;  %v848_v12 = vsel %vm72_vm5, %v846_v10, %v847_v6  ;;  %v849_v16 = vsel %vm72_vm5, %v847_v6, %v846_v10 }
 0x21e   :  { %v844_v9 = vsel %vm23_vm2, 0.0, %v839_v7  ;;  %v845_v14 = vsel %vm831_vm9, 0.0, %v838_v11  ;;  %v854_v15 = vsel %vm828_vm10, 0.0, %v848_v12  ;;  %v855_v17 = vsel %vm28_vm6, 0.0, %v849_v16  ;;  %1640 = vmatprep.subr.bf16.mxu1 %v1639_v23 }
 0x21f   :  { %1606 = vmatprep.mubr.msk.f32.mxu0 %vm461_vm8, %v844_v9 }
 0x223   :  { %1607 = vmatmul.mubr.msk.f32.vlgmr.msra.gmra.mrb[4].mxu0 %vm461_vm8, %v845_v14 }
 0x224   :  { %1610 = vmatpush3.msra.mxu0 %v1020_v3  ;;  %1611 = vmatprep.mubr.msk.f32.mxu0 %vm461_vm8, %v854_v15 }
 0x22b   :  { %1612 = vmatmul.mubr.msk.f32.vlgmr.msra.gmra.mrb[4].mxu0 %vm461_vm8, %v855_v17 }
 0x2fe   :  { %v1613_v25 = vpop.f32.mrb[4].mxu0 }
 0x2ff   :  { %v1110_v26 = vadd.f32 %v1613_v25, %v1488_v24  ;;  %v1093_v27 = vpop.f32.mrb[5].mxu0 }
 0x300   :  { %v1109_v28 = vadd.f32 %v1488_v24, %v1093_v27 }
 0x301   :  { %v1490_v29 = vmul.f32 -1.442695, %v1110_v26  ;;  %1414 = vrot.lane.b32.xlu1 %v1110_v26, %s1749_s12 }
 0x302   :  { %v1489_v30 = vmul.f32 -1.442695, %v1109_v28  ;;  %1412 = vrot.lane.b32.xlu0 %v1109_v28, %s1749_s12 }
 0x303   :  { %1708 = vpow2.f32 %v1490_v29 }
 0x304   :  { %1710 = vpow2.f32 %v1489_v30 }
 0x30d   :  { %v1709_v31 = vpop.eup %1708 }
 0x30e   :  { %v1711_v32 = vpop.eup %1710  ;;  %v1118_v33 = vadd.f32 1.0, %v1709_v31 }
 0x30f   :  { %v1117_v34 = vadd.f32 1.0, %v1711_v32 }
 0x310   :  { %1712 = vrcp.f32 %v1118_v33 }
 0x311   :  { %1714 = vrcp.f32 %v1117_v34 }
 0x31a   :  { %v1713_v35 = vpop.eup %1712 }
 0x31b   :  { %v1715_v38 = vpop.eup %1714  ;;  %v1124_v39 = vmul.f32 %v1713_v35, %v1110_v26 }
 0x31c   :  { %v1123_v40 = vmul.f32 %v1715_v38, %v1109_v28 }
 0x31d   :  { %v1126_v41 = vrot.slane %v1124_v39, 7  ;;  %v1132_v43 = vrot.slane %v1124_v39, 1 }
 0x31e   :  { %1618 = vmatprep.mubr.msk.f32.mxu1 %vm1141_vm11, %v1123_v40  ;;  %v1125_v44 = vrot.slane %v1123_v40, 7  ;;  %v1131_v45 = vrot.slane %v1123_v40, 1 }
 0x31f   :  { %1619 = vmatmul.mubr.msk.f32.vlgmr.msra.gmra.mrb[4].mxu1 %vm1141_vm11, %v1124_v39 }
 0x320   :  { %1642 = vmatpush3.bf16.msra.mxu1 %v1639_v23  ;;  %v1128_v46 = vsel %vm51_vm3, %v1126_v41, %v1125_v44  ;;  %v1127_v47 = vsel %vm51_vm3, %v1125_v44, %v1126_v41  ;;  %v1133_v48 = vsel %vm72_vm5, %v1131_v45, %v1132_v43  ;;  %v1134_v49 = vsel %vm72_vm5, %v1132_v43, %v1131_v45 }
 0x321   :  { %v1129_v50 = vsel %vm23_vm2, 0.0, %v1128_v46  ;;  %1644 = vmatprep.subr.bf16.mxu1 %v1643_v42  ;;  %v1130_v51 = vsel %vm831_vm9, 0.0, %v1127_v47  ;;  %v1135_v52 = vsel %vm828_vm10, 0.0, %v1133_v48  ;;  %v1136_v53 = vsel %vm28_vm6, 0.0, %v1134_v49 }
 0x322   :  { %1625 = vmatprep.mubr.msk.f32.mxu1 %vm1141_vm11, %v1129_v50 }
 0x327   :  { %1626 = vmatmul.mubr.msk.f32.vlgmr.msra.gmra.mrb[4].mxu1 %vm1141_vm11, %v1130_v51 }
 0x328   :  { %1646 = vmatpush3.bf16.msra.mxu1 %v1643_v42  ;;  %1632 = vmatprep.mubr.msk.f32.mxu1 %vm1141_vm11, %v1135_v52 }
 0x32f   :  { %1633 = vmatmul.mubr.msk.f32.vlgmr.msra.gmra.mrb[4].mxu1 %vm1141_vm11, %v1136_v53 }
 0x373   :  { %v1415_v2 = vpop.permute.xlu1 %1414 }
 0x374   :  { %v1413_v4 = vpop.permute.xlu0 %1412 }
 0x402   :  { %v1634_v55 = vpop.f32.mrb[4].mxu1 }
 0x403   :  { %v1395_v56 = vadd.f32 %v1634_v55, %v1497_v54  ;;  %v1378_v57 = vpop.f32.mrb[5].mxu1 }
 0x404   :  { %v1394_v58 = vadd.f32 %v1497_v54, %v1378_v57 }
 0x405   :  { %v1499_v59 = vmul.f32 -1.442695, %v1395_v56 }
 0x406   :  { %v1498_v60 = vmul.f32 -1.442695, %v1394_v58 }
 0x407   :  { %1716 = vpow2.f32 %v1499_v59 }
 0x408   :  { %1718 = vpow2.f32 %v1498_v60 }
 0x411   :  { %v1717_v8 = vpop.eup %1716 }
 0x412   :  { %v1719_v61 = vpop.eup %1718  ;;  %v1403_v62 = vadd.f32 1.0, %v1717_v8 }
 0x413   :  { %v1402_v63 = vadd.f32 1.0, %v1719_v61 }
 0x414   :  { %1720 = vrcp.f32 %v1403_v62 }
 0x415   :  { %1722 = vrcp.f32 %v1402_v63 }
 0x41e   :  { %v1721_v22 = vpop.eup %1720 }
 0x41f   :  { %v1723_v0 = vpop.eup %1722  ;;  %v1409_v1 = vmul.f32 %v1721_v22, %v1395_v56 }
 0x420   :  { %v1408_v3 = vmul.f32 %v1723_v0, %v1394_v58 }
 0x421   :  { %v1419_v5 = vadd.f32 %v1415_v2, %v1409_v1 }
 0x422   :  { %v1418_v6 = vadd.f32 %v1413_v4, %v1408_v3 }
 0x423   :  { %1421 = vst.msk [vmem:[#allocation2 + $0x8] sm:$0xff] %vm1141_vm11, %v1419_v5 }
 0x424   :  { %1420 = vst.msk [vmem:[#allocation2] sm:$0xff] %vm1141_vm11, %v1418_v6 }
 0x425   :  { %1735 = shalt.err (!%p1732_p4)
}
 0x426   :  { %s1736_s23 = scalar_lea.hbm %s2028_s3, 256 }
 0x427   :  { %p1737_p5 = scmp.ne.s32.totalorder %s2028_s3, %s1736_s23  ;;  %p1740_p6 = scmp.lt.u32.totalorder %s1736_s23, %s2028_s3 }
 0x429   :  { %p1742_p7 = pnand %p1740_p6, %p1737_p5 }
 0x42b   :  { %1745 = shalt.err (!%p1742_p7)
}
 0x42c   :  { %s1751_s27 = smov 128   ;;  %s1752_s28 = smov 8  }
 0x42d   :  { %1435 = dma.vmem_to_hbm [thread:$0]  %s1430_s20, 256, %s2028_s3, [#allocation3], %s1751_s27, %s1751_s27, %s1752_s28  }
 0x42e   :  { %1746 = dma.done.wait [#allocation3], 256  }
 0x42f   :  { %1747 = vsyncadd [#allocation3], 4294967040 }
 0x430   :  { %1441 = vsyncpa [#allocation3], 1 }

</bundles_post_ra>
